<compile_context>
chip_gen: v5e
topology: v5e:2x2
jax: 0.10.0
libtpu: 0.0.40
codegen_flags: <defaults>
</compile_context>

<pallas_src>
import functools

import jax
import jax.numpy as jnp
from jax import lax
from jax.experimental import pallas as pl
from jax.experimental.pallas import tpu as pltpu


def _elu(x):
    # nn.ELU(alpha=1.0): x if x > 0 else exp(x) - 1.
    # exp(min(x, 0)) keeps the discarded branch finite in bf16.
    return jnp.where(x > 0, x, jnp.exp(jnp.minimum(x, 0)) - 1)


def discriminator_z_kernel(x_ref, w1_ref, b1_ref, w2_ref, b2_ref,
                           w3_ref, b3_ref, o_ref, *, act_dtype):
    # x_ref : (tb, z)     f32   -- native layout, streamed per grid step
    # w1_ref: (128, z)    bf16  -- resident (constant index map)
    # b1_ref: (128, 1)    act_dtype
    # w2_ref: (128, 128)  bf16  -- resident
    # b2_ref: (128, 1)    act_dtype
    # w3_ref: (128, 1)    f32
    # b3_ref: (1, 1)      f32   -- SMEM scalar
    # o_ref : (1, tb)     f32   -- lane-dense output tile (batch on lanes)
    x = x_ref[...].astype(jnp.bfloat16)                      # (tb, z)

    # layer 1: contract z in-kernel; result is feature-major (128, tb)
    h1 = lax.dot_general(
        w1_ref[...], x,
        dimension_numbers=(((1,), (1,)), ((), ())),
        preferred_element_type=jnp.float32)
    h1 = _elu(h1.astype(act_dtype) + b1_ref[...])
    h1 = h1.astype(jnp.bfloat16)          # single bf16 copy fed to the MXU

    # layer 2 + ELU
    h2 = jnp.dot(w2_ref[...], h1, preferred_element_type=jnp.float32)
    h2 = _elu(h2.astype(act_dtype) + b2_ref[...])

    # layer 3 (128 -> 1): VPU multiply + sublane reduction -> (1, tb), f32
    h3 = jnp.sum(h2.astype(jnp.float32) * w3_ref[...],
                 axis=0, keepdims=True) + b3_ref[0, 0]

    # sigmoid: exp on EUP, approximate reciprocal on EUP
    o_ref[...] = pl.reciprocal(1.0 + jnp.exp(-h3), approx=True).astype(o_ref.dtype)


def _default_act_dtype():
    # bf16 activation math on chips with bf16 VPU/EUP (v6e / v7x); f32 on
    # v5-class and older chips (no bf16 VALU/EUP there).
    try:
        kind = jax.devices()[0].device_kind.lower()
    except Exception:  # pragma: no cover
        return jnp.bfloat16
    if any(tag in kind for tag in ("v2", "v3", "v4", "v5")):
        return jnp.float32
    return jnp.bfloat16


def discriminator_z(x, params, *, tile_batch=4096, act_dtype=None):
    """x: (batch, z) float32. Returns (batch, 1) float32 in (0, 1)."""
    w1, b1, w2, b2, w3, b3 = params
    batch, z = x.shape
    hidden = w1.shape[1]
    if act_dtype is None:
        act_dtype = _default_act_dtype()

    def round_up(a, m):
        return ((a + m - 1) // m) * m

    # Tile choice: lane-dense output (multiple of 128), and >= 2 grid steps
    # whenever possible so the "parallel" axis shards across v7x's 2 TCs.
    padded = round_up(batch, 128)
    if padded >= 256:
        tb = min(tile_batch, round_up(padded // 2, 128))
    else:
        tb = padded
    padded = round_up(padded, tb)
    num_tiles = padded // tb

    # x stays in its native (batch, z) f32 layout; only pad when the batch is
    # not already a tile multiple (no transpose / cast pre-pass in HBM).
    x_in = x if padded == batch else jnp.pad(x, ((0, padded - batch), (0, 0)))

    # Tiny weight-side casts (weights are <100 KiB total).
    w1T = w1.T.astype(jnp.bfloat16)                    # (hidden, z)
    w2T = w2.T.astype(jnp.bfloat16)                    # (hidden, hidden)
    b1c = b1.reshape(hidden, 1).astype(act_dtype)
    b2c = b2.reshape(hidden, 1).astype(act_dtype)
    w3c = w3.reshape(hidden, 1).astype(jnp.float32)
    b3s = b3.reshape(1, 1).astype(jnp.float32)

    kernel = functools.partial(discriminator_z_kernel, act_dtype=act_dtype)

    out = pl.pallas_call(
        kernel,
        out_shape=jax.ShapeDtypeStruct((1, padded), jnp.float32),
        grid=(num_tiles,),
        in_specs=[
            pl.BlockSpec((tb, z), lambda i: (i, 0)),            # x tile (streamed)
            pl.BlockSpec((hidden, z), lambda i: (0, 0)),        # W1^T (resident)
            pl.BlockSpec((hidden, 1), lambda i: (0, 0)),        # b1
            pl.BlockSpec((hidden, hidden), lambda i: (0, 0)),   # W2^T (resident)
            pl.BlockSpec((hidden, 1), lambda i: (0, 0)),        # b2
            pl.BlockSpec((hidden, 1), lambda i: (0, 0)),        # w3 column
            pl.BlockSpec(memory_space=pltpu.MemorySpace.SMEM),  # b3 scalar
        ],
        out_specs=pl.BlockSpec((1, tb), lambda i: (0, i)),
        compiler_params=pltpu.CompilerParams(
            dimension_semantics=("parallel",),
            vmem_limit_bytes=32 * 1024 * 1024),
    )(x_in, w1T, b1c, w2T, b2c, w3c, b3s)

    return out[0, :batch].reshape(batch, 1)


def init_params(key, z_dim):
    """Deterministic init mimicking nn.Linear's U(-1/sqrt(fan_in), 1/sqrt(fan_in))."""
    dims = [(z_dim, 128), (128, 128), (128, 1)]
    params = []
    for fan_in, fan_out in dims:
        key, kw, kb = jax.random.split(key, 3)
        bound = 1.0 / jnp.sqrt(float(fan_in))
        w = jax.random.uniform(kw, (fan_in, fan_out), jnp.float32, -bound, bound)
        b = jax.random.uniform(kb, (fan_out,), jnp.float32, -bound, bound)
        params += [w, b]
    return params


def reference_forward(x, params):
    """Pure-JAX f32 reference matching the PyTorch forward semantics."""
    w1, b1, w2, b2, w3, b3 = params

    def elu(v):
        return jnp.where(v > 0, v, jnp.exp(jnp.minimum(v, 0)) - 1)

    h = elu(x @ w1 + b1)
    h = elu(h @ w2 + b2)
    return jax.nn.sigmoid(h @ w3 + b3)


if __name__ == "__main__":
    batch_size = 2
    z_dim = 32

    key = jax.random.PRNGKey(0)
    key, kx = jax.random.split(key)
    # PyTorch forward flattens via x.view(batch, -1); feed the flat layout.
    x = jax.random.normal(kx, (batch_size, z_dim), jnp.float32)

    params = init_params(key, z_dim)

    out = jax.block_until_ready(discriminator_z(x, params))
    ref = reference_forward(x, params)

    assert out.shape == (batch_size, 1)
    # bf16 MXU / bf16 activation math + approx reciprocal -> loosened tolerance.
    assert jnp.allclose(out, ref, atol=2e-2, rtol=2e-2), (out, ref)

    print("KERNEL_OK")
</pallas_src>

<mosaic_0001>
module attributes {stable_mosaic.version = 11 : i64} {
  func.func @discriminator_z_kernel(%arg0: i32, %arg1: memref<128x32xf32, #tpu.memory_space<vmem>>, %arg2: memref<128x32xbf16, #tpu.memory_space<vmem>>, %arg3: memref<128x1xbf16, #tpu.memory_space<vmem>>, %arg4: memref<128x128xbf16, #tpu.memory_space<vmem>>, %arg5: memref<128x1xbf16, #tpu.memory_space<vmem>>, %arg6: memref<128x1xf32, #tpu.memory_space<vmem>>, %arg7: memref<1x1xf32, #tpu.memory_space<smem>>, %arg8: memref<1x128xf32, #tpu.memory_space<vmem>>) attributes {dimension_semantics = [#tpu.dimension_semantics<parallel>], iteration_bounds = array<i64: 1>, scalar_prefetch = 0 : i64, scratch_operands = 0 : i64, tpu.core_type = #tpu.core_type<tc>, window_params = [{transform_indices = @transform_0, window_bounds = array<i64: 128, 32>}, {pipeline_mode = #tpu.pipeline_mode<synchronous>, transform_indices = @transform_1, window_bounds = array<i64: 128, 32>}, {pipeline_mode = #tpu.pipeline_mode<synchronous>, transform_indices = @transform_2, window_bounds = array<i64: 128, 1>}, {pipeline_mode = #tpu.pipeline_mode<synchronous>, transform_indices = @transform_3, window_bounds = array<i64: 128, 128>}, {pipeline_mode = #tpu.pipeline_mode<synchronous>, transform_indices = @transform_4, window_bounds = array<i64: 128, 1>}, {pipeline_mode = #tpu.pipeline_mode<synchronous>, transform_indices = @transform_5, window_bounds = array<i64: 128, 1>}, {transform_indices = @transform_6, window_bounds = array<i64: 1, 1>}, {transform_indices = @transform_7, window_bounds = array<i64: 1, 128>}]} {
    %c0 = arith.constant 0 : index
    %c0_0 = arith.constant 0 : index
    %0 = vector.load %arg1[%c0, %c0_0] : memref<128x32xf32, #tpu.memory_space<vmem>>, vector<128x32xf32>
    %1 = arith.truncf %0 : vector<128x32xf32> to vector<128x32xbf16>
    %c0_1 = arith.constant 0 : index
    %c0_2 = arith.constant 0 : index
    %2 = vector.load %arg2[%c0_1, %c0_2] : memref<128x32xbf16, #tpu.memory_space<vmem>>, vector<128x32xbf16>
    %cst = arith.constant dense<0.000000e+00> : vector<128x128xf32>
    %3 = tpu.matmul %2, %1, %cst {dimension_numbers = #tpu.dot_dimension_numbers<[1], [1], [0], [0], [0, 0, 1, 0], [], []>} : vector<128x32xbf16>, vector<128x32xbf16>, vector<128x128xf32> -> vector<128x128xf32>
    %4 = arith.truncf %3 : vector<128x128xf32> to vector<128x128xbf16>
    %c0_3 = arith.constant 0 : index
    %c0_4 = arith.constant 0 : index
    %5 = vector.load %arg3[%c0_3, %c0_4] : memref<128x1xbf16, #tpu.memory_space<vmem>>, vector<128x1xbf16>
    %6 = vector.broadcast %5 : vector<128x1xbf16> to vector<128x128xbf16>
    %7 = arith.addf %4, %6 : vector<128x128xbf16>
    %cst_5 = arith.constant 0.000000e+00 : bf16
    %8 = vector.broadcast %cst_5 : bf16 to vector<128x128xbf16>
    %9 = arith.cmpf ogt, %7, %8 : vector<128x128xbf16>
    %cst_6 = arith.constant 0.000000e+00 : bf16
    %10 = vector.broadcast %cst_6 : bf16 to vector<128x128xbf16>
    %11 = arith.minimumf %7, %10 : vector<128x128xbf16>
    %12 = math.exp %11 : vector<128x128xbf16>
    %cst_7 = arith.constant 1.000000e+00 : bf16
    %13 = vector.broadcast %cst_7 : bf16 to vector<128x128xbf16>
    %14 = arith.subf %12, %13 : vector<128x128xbf16>
    %15 = arith.select %9, %7, %14 : vector<128x128xi1>, vector<128x128xbf16>
    %c0_8 = arith.constant 0 : index
    %c0_9 = arith.constant 0 : index
    %16 = vector.load %arg4[%c0_8, %c0_9] : memref<128x128xbf16, #tpu.memory_space<vmem>>, vector<128x128xbf16>
    %cst_10 = arith.constant dense<0.000000e+00> : vector<128x128xf32>
    %17 = tpu.matmul %16, %15, %cst_10 {dimension_numbers = #tpu.dot_dimension_numbers<[1], [0], [0], [1], [0, 0, 1, 1], [], []>} : vector<128x128xbf16>, vector<128x128xbf16>, vector<128x128xf32> -> vector<128x128xf32>
    %18 = arith.truncf %17 : vector<128x128xf32> to vector<128x128xbf16>
    %c0_11 = arith.constant 0 : index
    %c0_12 = arith.constant 0 : index
    %19 = vector.load %arg5[%c0_11, %c0_12] : memref<128x1xbf16, #tpu.memory_space<vmem>>, vector<128x1xbf16>
    %20 = vector.broadcast %19 : vector<128x1xbf16> to vector<128x128xbf16>
    %21 = arith.addf %18, %20 : vector<128x128xbf16>
    %cst_13 = arith.constant 0.000000e+00 : bf16
    %22 = vector.broadcast %cst_13 : bf16 to vector<128x128xbf16>
    %23 = arith.cmpf ogt, %21, %22 : vector<128x128xbf16>
    %cst_14 = arith.constant 0.000000e+00 : bf16
    %24 = vector.broadcast %cst_14 : bf16 to vector<128x128xbf16>
    %25 = arith.minimumf %21, %24 : vector<128x128xbf16>
    %26 = math.exp %25 : vector<128x128xbf16>
    %cst_15 = arith.constant 1.000000e+00 : bf16
    %27 = vector.broadcast %cst_15 : bf16 to vector<128x128xbf16>
    %28 = arith.subf %26, %27 : vector<128x128xbf16>
    %29 = arith.select %23, %21, %28 : vector<128x128xi1>, vector<128x128xbf16>
    %30 = arith.extf %29 : vector<128x128xbf16> to vector<128x128xf32>
    %c0_16 = arith.constant 0 : index
    %c0_17 = arith.constant 0 : index
    %31 = vector.load %arg6[%c0_16, %c0_17] : memref<128x1xf32, #tpu.memory_space<vmem>>, vector<128x1xf32>
    %32 = vector.broadcast %31 : vector<128x1xf32> to vector<128x128xf32>
    %33 = arith.mulf %30, %32 : vector<128x128xf32>
    %cst_18 = arith.constant dense<0.000000e+00> : vector<128xf32>
    %34 = vector.multi_reduction <add>, %33, %cst_18 [0] : vector<128x128xf32> to vector<128xf32>
    %35 = vector.shape_cast %34 : vector<128xf32> to vector<1x128xf32>
    %c0_19 = arith.constant 0 : index
    %c0_20 = arith.constant 0 : index
    %36 = memref.load %arg7[%c0_19, %c0_20] : memref<1x1xf32, #tpu.memory_space<smem>>
    %37 = vector.broadcast %36 : f32 to vector<1x128xf32>
    %38 = arith.addf %35, %37 : vector<1x128xf32>
    %cst_21 = arith.constant 0.000000e+00 : f32
    %39 = vector.broadcast %cst_21 : f32 to vector<1x128xf32>
    %40 = arith.subf %39, %38 : vector<1x128xf32>
    %41 = math.exp %40 : vector<1x128xf32>
    %cst_22 = arith.constant 1.000000e+00 : f32
    %42 = vector.broadcast %cst_22 : f32 to vector<1x128xf32>
    %43 = arith.addf %42, %41 : vector<1x128xf32>
    %44 = tpu.reciprocal %43 {approx = true} : vector<1x128xf32> -> vector<1x128xf32>
    %c0_23 = arith.constant 0 : index
    %c0_24 = arith.constant 0 : index
    %45 = vector.load %arg8[%c0_23, %c0_24] : memref<1x128xf32, #tpu.memory_space<vmem>>, vector<1x128xf32>
    tpu.vector_store %arg8[%c0_23, %c0_24], %44 {strides = array<i32>} : memref<1x128xf32, #tpu.memory_space<vmem>>, vector<1x128xf32>,
    return
  }
  func.func @transform_0(%arg0: i32) -> (i32, i32) {
    %c0_i32 = arith.constant 0 : i32
    %c0_i32_0 = arith.constant 0 : i32
    return %arg0, %c0_i32 : i32, i32
  }
  func.func @transform_1(%arg0: i32) -> (i32, i32) {
    %c0_i32 = arith.constant 0 : i32
    %c0_i32_0 = arith.constant 0 : i32
    %c0_i32_1 = arith.constant 0 : i32
    return %c0_i32, %c0_i32_0 : i32, i32
  }
  func.func @transform_2(%arg0: i32) -> (i32, i32) {
    %c0_i32 = arith.constant 0 : i32
    %c0_i32_0 = arith.constant 0 : i32
    %c0_i32_1 = arith.constant 0 : i32
    return %c0_i32, %c0_i32_0 : i32, i32
  }
  func.func @transform_3(%arg0: i32) -> (i32, i32) {
    %c0_i32 = arith.constant 0 : i32
    %c0_i32_0 = arith.constant 0 : i32
    %c0_i32_1 = arith.constant 0 : i32
    return %c0_i32, %c0_i32_0 : i32, i32
  }
  func.func @transform_4(%arg0: i32) -> (i32, i32) {
    %c0_i32 = arith.constant 0 : i32
    %c0_i32_0 = arith.constant 0 : i32
    %c0_i32_1 = arith.constant 0 : i32
    return %c0_i32, %c0_i32_0 : i32, i32
  }
  func.func @transform_5(%arg0: i32) -> (i32, i32) {
    %c0_i32 = arith.constant 0 : i32
    %c0_i32_0 = arith.constant 0 : i32
    %c0_i32_1 = arith.constant 0 : i32
    return %c0_i32, %c0_i32_0 : i32, i32
  }
  func.func @transform_6(%arg0: i32) -> (i32, i32) {
    %c0_i32 = arith.constant 0 : i32
    %c0_i32_0 = arith.constant 0 : i32
    %c0_i32_1 = arith.constant 0 : i32
    return %c0_i32, %c0_i32_0 : i32, i32
  }
  func.func @transform_7(%arg0: i32) -> (i32, i32) {
    %c0_i32 = arith.constant 0 : i32
    %c0_i32_0 = arith.constant 0 : i32
    return %c0_i32, %arg0 : i32, i32
  }
}

</mosaic_0001>

<bundles_post_ra>
// kernel: tpu_custom_call.1
= control target key start
LH: loop header
LB: loop body
LE: loop exit
PB: predicated region body
PF: predicated region fallthrough
CT: control target
= control target key end

     0   :  { %vm108_vm0 = vcmask 261120   ;;  %v1673_v4 = vmov 0   ;;  %s2535_s0 = inlined_call_operand.vmem [shape: f32[128,32], index: 0, kind: input, shape index: {}]   ;;  %s2536_s1 = inlined_call_operand.vmem [shape: bf16[128,32], index: 1, kind: input, shape index: {}]   ;;  %s2537_s2 = inlined_call_operand.vmem [shape: bf16[128,1], index: 2, kind: input, shape index: {}]   ;;  %s2538_s3 = inlined_call_operand.vmem [shape: bf16[128,128], index: 3, kind: input, shape index: {}]   ;;  %s2539_s4 = inlined_call_operand.vmem [shape: bf16[128,1], index: 4, kind: input, shape index: {}]   ;;  %s2540_s5 = inlined_call_operand.vmem [shape: f32[128,1], index: 5, kind: input, shape index: {}]   ;;  %s2541_s6 = inlined_call_operand.<no memory space> [shape: f32[1,1], index: 6, kind: input, shape index: {}]   ;;  %s2542_s7 = inlined_call_operand.hbm [shape: f32[1,128], index: 7, kind: output, shape index: {}]  }
   0x1   :  { %v42_v0 = vld [vmem:[%s2535_s0 + $0x70] sm:$0xff]  ;;  %v43_v1 = vld [vmem:[%s2535_s0 + $0x78] sm:$0xff]  ;;  %v40_v3 = vld [vmem:[%s2535_s0 + $0x60] sm:$0xff]  ;;  %1576 = vset.pattern.permute.xlu0 %v1673_v4  ;;  %1577 = vset.pattern.permute.xlu1 %v1673_v4 }
   0x2   :  { %v51_v2 = vpack.c.bf16 %v43_v1, %v42_v0  ;;  %v41_v5 = vld [vmem:[%s2535_s0 + $0x68] sm:$0xff]  ;;  %v236_v6 = vld [vmem:[%s2537_s2 + $0x38] sm:$0xf]  ;;  %v234_v7 = vld [vmem:[%s2537_s2 + $0x30] sm:$0xf]  ;;  %1578 = vset.pattern.permute.xlu2 %v1673_v4 }
   0x3   :  { %366 = vperm.xlu0 %1576, %v236_v6   ;;  %348 = vperm.xlu1 %1577, %v234_v7   ;;  %v50_v9 = vpack.c.bf16 %v41_v5, %v40_v3 }
   0x4   :  { %v155_v8 = vsel %vm108_vm0, %v51_v2, 0 }
   0x5   :  { %1557 = vmatpush.bf16.xpose.msra.mxu2 %v155_v8  ;;  %157 = vmatpush.bf16.xpose.msra.mxu0 %v155_v8 }
   0x6   :  { %13 = vsyncpa [#allocation4], 0  ;;  %v237_v10 = vld [vmem:[%s2537_s2 + $0x3c] sm:$0xf]  ;;  %v235_v11 = vld [vmem:[%s2537_s2 + $0x34] sm:$0xf] }
   0x7   :  { %v152_v12 = vsel %vm108_vm0, %v50_v9, 0  ;;  %v38_v13 = vld [vmem:[%s2535_s0 + $0x50] sm:$0xff]  ;;  %v39_v14 = vld [vmem:[%s2535_s0 + $0x58] sm:$0xff]  ;;  %v230_v16 = vld [vmem:[%s2537_s2 + $0x20] sm:$0xf]  ;;  %s1675_s12 = smov [#allocation3]  }
   0x8   :  { %v49_v15 = vpack.c.bf16 %v39_v14, %v38_v13  ;;  %v231_v17 = vld [vmem:[%s2537_s2 + $0x24] sm:$0xf]  ;;  %v37_v20 = vld [vmem:[%s2535_s0 + $0x48] sm:$0xff]  ;;  %v229_v23 = vld [vmem:[%s2537_s2 + $0x1c] sm:$0xf]  ;;  %s1426_s13 = sshll.u32 %s1675_s12, 4  ;;  %s1427_s13 = int_to_ptr.vmem [resolvable:$true] %s1426_s13 }
   0x9   :  { %v36_v19 = vld [vmem:[%s2535_s0 + $0x40] sm:$0xff]  ;;  %v232_v21 = vld [vmem:[%s2537_s2 + $0x28] sm:$0xf]  ;;  %v226_v24 = vld [vmem:[%s2537_s2 + $0x10] sm:$0xf]  ;;  %s1428_s16 = sshll.u32 %s2542_s7, 4  ;;  %s1429_s16 = int_to_ptr.hbm [resolvable:$true] %s1428_s16 }
   0xa   :  { %v149_v18 = vsel %vm108_vm0, %v49_v15, 0  ;;  %v48_v22 = vpack.c.bf16 %v37_v20, %v36_v19  ;;  %330 = vperm.xlu2 %1578, %v232_v21   ;;  %v34_v26 = vld [vmem:[%s2535_s0 + $0x30] sm:$0xff]  ;;  %v35_v27 = vld [vmem:[%s2535_s0 + $0x38] sm:$0xff]  ;;  %v233_v28 = vld [vmem:[%s2537_s2 + $0x2c] sm:$0xf] }
   0xb   :  { %375 = vperm.xlu0 %1576, %v237_v10   ;;  %357 = vperm.xlu1 %1577, %v235_v11   ;;  %v47_v29 = vpack.c.bf16 %v35_v27, %v34_v26  ;;  %v224_v30 = vld [vmem:[%s2537_s2 + $0x8] sm:$0xf]  ;;  %v225_v31 = vld [vmem:[%s2537_s2 + $0xc] sm:$0xf]  ;;  %v32_v33 = vld [vmem:[%s2535_s0 + $0x20] sm:$0xff] }
   0xc   :  { %v146_v25 = vsel %vm108_vm0, %v48_v22, 0  ;;  %v33_v34 = vld [vmem:[%s2535_s0 + $0x28] sm:$0xff]  ;;  %v228_v35 = vld [vmem:[%s2537_s2 + $0x18] sm:$0xf]  ;;  %v223_v37 = vld [vmem:[%s2537_s2 + $0x4] sm:$0xf] }
   0xd   :  { %1558 = vmatpush.bf16.xpose.msra.mxu2 %v152_v12  ;;  %158 = vmatpush.bf16.xpose.msra.mxu0 %v152_v12  ;;  %v143_v32 = vsel %vm108_vm0, %v47_v29, 0  ;;  %v46_v36 = vpack.c.bf16 %v33_v34, %v32_v33  ;;  %v831_v38 = vld [vmem:[%s2539_s4] sm:$0xf]  ;;  %v30_v40 = vld [vmem:[%s2535_s0 + $0x10] sm:$0xff]  ;;  %v31_v41 = vld [vmem:[%s2535_s0 + $0x18] sm:$0xff] }
   0xe   :  { %v227_v42 = vld [vmem:[%s2537_s2 + $0x14] sm:$0xf]  ;;  %v45_v43 = vpack.c.bf16 %v31_v41, %v30_v40  ;;  %v833_v44 = vld [vmem:[%s2539_s4 + $0x8] sm:$0xf]  ;;  %v834_v45 = vld [vmem:[%s2539_s4 + $0xc] sm:$0xf] }
   0xf   :  { %v140_v39 = vsel %vm108_vm0, %v46_v36, 0  ;;  %v28_v47 = vld [vmem:[%s2535_s0] sm:$0xff]  ;;  %v29_v48 = vld [vmem:[%s2535_s0 + $0x8] sm:$0xff]  ;;  %v836_v51 = vld [vmem:[%s2539_s4 + $0x14] sm:$0xf] }
  0x10   :  { %v137_v46 = vsel %vm108_vm0, %v45_v43, 0  ;;  %v222_v49 = vld [vmem:[%s2537_s2] sm:$0xf]  ;;  %v44_v50 = vpack.c.bf16 %v29_v48, %v28_v47  ;;  %v837_v52 = vld [vmem:[%s2539_s4 + $0x18] sm:$0xf]  ;;  %v1542_v0 = vld [vmem:[%s2536_s1 + $0x8] sm:$0xff] }
  0x11   :  { %v832_v54 = vld [vmem:[%s2539_s4 + $0x4] sm:$0xf]  ;;  %v1544_v55 = vld [vmem:[%s2536_s1 + $0x18] sm:$0xff]  ;;  %v839_v57 = vld [vmem:[%s2539_s4 + $0x20] sm:$0xf] }
  0x12   :  { %339 = vperm.xlu2 %1578, %v233_v28   ;;  %v134_v53 = vsel %vm108_vm0, %v44_v50, 0  ;;  %v1541_v56 = vld [vmem:[%s2536_s1] sm:$0xff]  ;;  %v835_v59 = vld [vmem:[%s2539_s4 + $0x10] sm:$0xf]  ;;  %v842_v60 = vld [vmem:[%s2539_s4 + $0x2c] sm:$0xf] }
  0x13   :  { %312 = vperm.xlu0 %1576, %v230_v16   ;;  %321 = vperm.xlu1 %1577, %v231_v17   ;;  %v840_v58 = vld [vmem:[%s2539_s4 + $0x24] sm:$0xf]  ;;  %v843_v61 = vld [vmem:[%s2539_s4 + $0x30] sm:$0xf]  ;;  %v838_v62 = vld [vmem:[%s2539_s4 + $0x1c] sm:$0xf] }
  0x14   :  { %v1545_v63 = vld [vmem:[%s2536_s1 + $0x20] sm:$0xff]  ;;  %v845_v1 = vld [vmem:[%s2539_s4 + $0x38] sm:$0xf]  ;;  %v846_v2 = vld [vmem:[%s2539_s4 + $0x3c] sm:$0xf] }
  0x15   :  { %1559 = vmatpush.bf16.xpose.msra.mxu2 %v149_v18  ;;  %159 = vmatpush.bf16.xpose.msra.mxu0 %v149_v18  ;;  %v841_v3 = vld [vmem:[%s2539_s4 + $0x28] sm:$0xf]  ;;  %v1281_v5 = vld [vmem:[%s2540_s5 + $0x10] sm:$0xff]  ;;  %v1283_v9 = vld [vmem:[%s2540_s5 + $0x20] sm:$0xff]  ;;  %v1674_v29 = vmov 839922192  }
  0x16   :  { %v1280_v4 = vld [vmem:[%s2540_s5 + $0x8] sm:$0xff]  ;;  %v844_v6 = vld [vmem:[%s2539_s4 + $0x34] sm:$0xf]  ;;  %v1279_v11 = vld [vmem:[%s2540_s5] sm:$0xff] }
  0x17   :  { %v1546_v7 = vld [vmem:[%s2536_s1 + $0x28] sm:$0xff]  ;;  %v1543_v8 = vld [vmem:[%s2536_s1 + $0x10] sm:$0xff]  ;;  %v1286_v12 = vld [vmem:[%s2540_s5 + $0x38] sm:$0xff] }
  0x18   :  { %v1284_v10 = vld [vmem:[%s2540_s5 + $0x28] sm:$0xff]  ;;  %v1287_v13 = vld [vmem:[%s2540_s5 + $0x40] sm:$0xff]  ;;  %v1282_v14 = vld [vmem:[%s2540_s5 + $0x18] sm:$0xff] }
  0x19   :  { %v1547_v15 = vld [vmem:[%s2536_s1 + $0x30] sm:$0xff]  ;;  %v1290_v17 = vld [vmem:[%s2540_s5 + $0x58] sm:$0xff]  ;;  %v1292_v19 = vld [vmem:[%s2540_s5 + $0x68] sm:$0xff] }
  0x1a   :  { %294 = vperm.xlu2 %1578, %v228_v35   ;;  %v1289_v16 = vld [vmem:[%s2540_s5 + $0x50] sm:$0xff]  ;;  %v1288_v21 = vld [vmem:[%s2540_s5 + $0x48] sm:$0xff]  ;;  %v1548_v22 = vld [vmem:[%s2536_s1 + $0x38] sm:$0xff] }
  0x1b   :  { %303 = vperm.xlu0 %1576, %v229_v23   ;;  %276 = vperm.xlu1 %1577, %v226_v24   ;;  %v1285_v18 = vld [vmem:[%s2540_s5 + $0x30] sm:$0xff]  ;;  %v1291_v23 = vld [vmem:[%s2540_s5 + $0x60] sm:$0xff]  ;;  %v1294_v24 = vld [vmem:[%s2540_s5 + $0x78] sm:$0xff] }
  0x1c   :  { %v1293_v20 = vld [vmem:[%s2540_s5 + $0x70] sm:$0xff] }
  0x1d   :  { %1560 = vmatpush.bf16.xpose.msra.mxu2 %v146_v25  ;;  %160 = vmatpush.bf16.xpose.msra.mxu0 %v146_v25 }
  0x22   :  { %285 = vperm.xlu2 %1578, %v227_v42  }
  0x23   :  { %258 = vperm.xlu0 %1576, %v224_v30   ;;  %267 = vperm.xlu1 %1577, %v225_v31   ;;  %v244_v30 = vunpack.c.l.s4 %v1674_v29 }
  0x25   :  { %1561 = vmatpush.bf16.xpose.msra.mxu2 %v143_v32  ;;  %161 = vmatpush.bf16.xpose.msra.mxu0 %v143_v32  ;;  %v1956_v31 = vunpack.c.0.s8 %v244_v30 }
  0x2a   :  { %240 = vperm.xlu2 %1578, %v222_v49  }
  0x2b   :  { %249 = vperm.xlu0 %1576, %v223_v37   ;;  %849 = vperm.xlu1 %1577, %v831_v38  }
  0x2d   :  { %1562 = vmatpush.bf16.xpose.msra.mxu2 %v140_v39  ;;  %162 = vmatpush.bf16.xpose.msra.mxu0 %v140_v39 }
  0x32   :  { %858 = vperm.xlu2 %1578, %v832_v54  }
  0x33   :  { %867 = vperm.xlu0 %1576, %v833_v44   ;;  %876 = vperm.xlu1 %1577, %v834_v45  }
  0x35   :  { %1563 = vmatpush.bf16.xpose.msra.mxu2 %v137_v46  ;;  %163 = vmatpush.bf16.xpose.msra.mxu0 %v137_v46 }
  0x3a   :  { %885 = vperm.xlu2 %1578, %v835_v59  }
  0x3b   :  { %894 = vperm.xlu0 %1576, %v836_v51   ;;  %903 = vperm.xlu1 %1577, %v837_v52  }
  0x3d   :  { %1564 = vmatpush.bf16.xpose.msra.mxu2 %v134_v53  ;;  %164 = vmatpush.bf16.xpose.msra.mxu0 %v134_v53 }
  0x42   :  { %912 = vperm.xlu2 %1578, %v838_v62  }
  0x43   :  { %921 = vperm.xlu0 %1576, %v839_v57   ;;  %930 = vperm.xlu1 %1577, %v840_v58  }
  0x44   :  { %1472 = vmatmul.msk.bf16.vlgmr.msra.gmra.mxu2 %vm108_vm0, %v1544_v55  ;;  %1469 = vmatmul.msk.bf16.vlgmr.msra.gmra.mxu0 %vm108_vm0, %v1541_v56 }
  0x4a   :  { %939 = vperm.xlu2 %1578, %v841_v3  }
  0x4b   :  { %948 = vperm.xlu0 %1576, %v842_v60   ;;  %957 = vperm.xlu1 %1577, %v843_v61  }
  0x52   :  { %966 = vperm.xlu2 %1578, %v844_v6  }
  0x53   :  { %975 = vperm.xlu0 %1576, %v845_v1   ;;  %984 = vperm.xlu1 %1577, %v846_v2  }
  0x54   :  { %1473 = vmatmul.msk.bf16.gmra.mxu2 %vm108_vm0, %v1545_v63  ;;  %1470 = vmatmul.msk.bf16.gmra.mxu0 %vm108_vm0, %v1542_v0 }
  0x5a   :  { %1297 = vperm.xlu2 %1578, %v1279_v11  }
  0x5b   :  { %1302 = vperm.xlu0 %1576, %v1280_v4   ;;  %1307 = vperm.xlu1 %1577, %v1281_v5  }
  0x62   :  { %1312 = vperm.xlu2 %1578, %v1282_v14  }
  0x63   :  { %1317 = vperm.xlu0 %1576, %v1283_v9   ;;  %1322 = vperm.xlu1 %1577, %v1284_v10  }
  0x64   :  { %1474 = vmatmul.msk.bf16.gmra.mxu2 %vm108_vm0, %v1546_v7  ;;  %1471 = vmatmul.msk.bf16.gmra.mxu0 %vm108_vm0, %v1543_v8  ;;  %v1950_v26 = vpop.permute.xlu2 %330 }
  0x65   :  { %v336_v30 = vperm.slane %v1950_v26, %v1956_v31 }
  0x6a   :  { %1327 = vperm.xlu2 %1578, %v1285_v18  }
  0x6b   :  { %1332 = vperm.xlu0 %1576, %v1286_v12   ;;  %1337 = vperm.xlu1 %1577, %v1287_v13  }
  0x6c   :  { %v1954_v28 = vpop.permute.xlu2 %339 }
  0x72   :  { %1342 = vperm.xlu2 %1578, %v1288_v21  }
  0x73   :  { %1347 = vperm.xlu0 %1576, %v1289_v16   ;;  %1352 = vperm.xlu1 %1577, %v1290_v17  }
  0x74   :  { %1475 = vmatmul.msk.bf16.gmra.mxu2 %vm108_vm0, %v1547_v15  ;;  %v295_v33 = vpop.permute.xlu2 %294 }
  0x75   :  { %v1948_v25 = vpop.permute.xlu0 %366  ;;  %v300_v34 = vperm.slane %v295_v33, %v1956_v31  ;;  %v349_v58 = vpop.permute.xlu1 %348  ;;  %v345_v33 = vperm.slane %v1954_v28, %v1956_v31 }
  0x77   :  { %v404_v36 = vunpack.c.l.bf16 %v300_v34 }
  0x7a   :  { %1357 = vperm.xlu2 %1578, %v1291_v23  }
  0x7b   :  { %1362 = vperm.xlu0 %1576, %v1292_v19   ;;  %1367 = vperm.xlu1 %1577, %v1293_v20   ;;  %v354_v20 = vperm.slane %v349_v58, %v1956_v31 }
  0x7c   :  { %v286_v21 = vpop.permute.xlu2 %285 }
  0x7d   :  { %v1952_v27 = vpop.permute.xlu0 %375  ;;  %v358_v3 = vpop.permute.xlu1 %357 }
  0x82   :  { %1372 = vperm.xlu2 %1578, %v1294_v24  }
  0x84   :  { %1476 = vmatmul.msk.bf16.gmra.mxu2 %vm108_vm0, %v1548_v22 }
  0x85   :  { %v1958_v32 = vpop.permute.xlu0 %312  ;;  %v322_v12 = vpop.permute.xlu1 %321 }
  0x86   :  { %v318_v26 = vperm.slane %v1958_v32, %v1956_v31 }
  0x8d   :  { %v304_v39 = vpop.permute.xlu0 %303  ;;  %v277_v24 = vpop.permute.xlu1 %276 }
  0x8e   :  { %v309_v40 = vperm.slane %v304_v39, %v1956_v31  ;;  %v282_v58 = vperm.slane %v277_v24, %v1956_v31 }
  0x90   :  { %v405_v45 = vunpack.c.l.bf16 %v309_v40  ;;  %v363_v40 = vperm.slane %v358_v3, %v1956_v31  ;;  %v381_v3 = vperm.slane %v1952_v27, %v1956_v31 }
  0x95   :  { %v259_v28 = vpop.permute.xlu0 %258 }
  0x9d   :  { %v250_v24 = vpop.permute.xlu0 %249 }
  0xc1   :  { %v1962_v42 = vpop.f32.mrf.mxu0 }
  0xc7   :  { %v181_v35 = vpop.f32.mrf.mxu2 }
  0xc8   :  { %v212_v37 = vpack.c.bf16 %v181_v35, %v181_v35 }
  0xc9   :  { %v1966_v56 = vpop.f32.mrf.mxu0 }
  0xca   :  { %v388_v38 = vunpack.c.l.bf16 %v212_v37 }
  0xcc   :  { %v420_v41 = vadd.f32 %v404_v36, %v388_v38  ;;  %v410_v36 = vunpack.c.l.bf16 %v354_v20  ;;  %v372_v38 = vperm.slane %v1948_v25, %v1956_v31  ;;  %v411_v25 = vunpack.c.l.bf16 %v363_v40 }
  0xce   :  { %v436_v43 = vpack.c.bf16 %v420_v41, %v420_v41  ;;  %v327_v41 = vperm.slane %v322_v12, %v1956_v31  ;;  %v402_v12 = vunpack.c.l.bf16 %v282_v58 }
  0xcf   :  { %v183_v44 = vpop.f32.mrf.mxu2 }
  0xd0   :  { %v452_v46 = vunpack.c.l.bf16 %v436_v43  ;;  %v213_v47 = vpack.c.bf16 %v183_v44, %v183_v44  ;;  %v408_v44 = vunpack.c.l.bf16 %v336_v30 }
  0xd1   :  { %v1968_v2 = vpop.f32.mrf.mxu0 }
  0xd2   :  { %v484_v48 = vmin.f32 %v452_v46, 0.0  ;;  %v389_v49 = vunpack.c.l.bf16 %v213_v47  ;;  %vm468_vm1 = vcmp.gt.f32.partialorder %v452_v46, 0.0 }
  0xd3   :  { %vm628_vm3 = vmpackc.low %vm468_vm1, %vm468_vm1 }
  0xd4   :  { %v500_v50 = vpack.c.bf16 %v484_v48, %v484_v48  ;;  %v421_v51 = vadd.f32 %v405_v45, %v389_v49  ;;  %v409_v45 = vunpack.c.l.bf16 %v345_v33 }
  0xd6   :  { %v516_v52 = vunpack.c.l.bf16 %v500_v50  ;;  %v437_v53 = vpack.c.bf16 %v421_v51, %v421_v51  ;;  %v412_v50 = vunpack.c.l.bf16 %v372_v38  ;;  %v407_v51 = vunpack.c.l.bf16 %v327_v41 }
  0xd7   :  { %v1964_v54 = vpop.f32.mrf.mxu2  ;;  %v207_v41 = vpack.c.bf16 %v1966_v56, %v1966_v56 }
  0xd8   :  { %v538_v55 = vmul.f32 1.442695, %v516_v52  ;;  %v453_v57 = vunpack.c.l.bf16 %v437_v53  ;;  %v214_v47 = vpack.c.bf16 %v1964_v54, %v1964_v54  ;;  %v291_v52 = vperm.slane %v286_v21, %v1956_v31 }
  0xd9   :  { %v1970_v10 = vpop.f32.mrf.mxu0  ;;  %v383_v58 = vunpack.c.l.bf16 %v207_v41 }
  0xda   :  { %1579 = vpow2.f32 %v538_v55  ;;  %v485_v59 = vmin.f32 %v453_v57, 0.0  ;;  %vm469_vm2 = vcmp.gt.f32.partialorder %v453_v57, 0.0  ;;  %v390_v54 = vunpack.c.l.bf16 %v214_v47 }
  0xdb   :  { %vm629_vm4 = vmpackc.low %vm469_vm2, %vm469_vm2  ;;  %v209_v21 = vpack.c.bf16 %v1970_v10, %v1970_v10 }
  0xdc   :  { %v501_v60 = vpack.c.bf16 %v485_v59, %v485_v59 }
  0xde   :  { %v517_v61 = vunpack.c.l.bf16 %v501_v60 }
  0xdf   :  { %v188_v62 = vpop.f32.mrf.mxu2 }
  0xe0   :  { %v1580_v63 = vpop.eup %1579  ;;  %v540_v0 = vmul.f32 1.442695, %v517_v61 }
  0xe1   :  { %v564_v1 = vpack.c.bf16 %v1580_v63, %v1580_v63  ;;  %v176_v23 = vpop.f32.mrf.mxu0  ;;  %v268_v63 = vpop.permute.xlu1 %267 }
  0xe2   :  { %1581 = vpow2.f32 %v540_v0 }
  0xe3   :  { %v580_v4 = vunpack.c.l.bf16 %v564_v1 }
  0xe5   :  { %v1483_v7 = vadd.f32 -1.0, %v580_v4  ;;  %v264_v4 = vperm.slane %v259_v28, %v1956_v31 }
  0xe7   :  { %v191_v5 = vpop.f32.mrf.mxu2  ;;  %v612_v11 = vpack.c.bf16 %v1483_v7, %v1483_v7  ;;  %v403_v7 = vunpack.c.l.bf16 %v291_v52 }
  0xe8   :  { %v1582_v6 = vpop.eup %1581  ;;  %v216_v37 = vpack.c.bf16 %v191_v5, %v191_v5  ;;  %v273_v5 = vperm.slane %v268_v63, %v1956_v31 }
  0xe9   :  { %v565_v8 = vpack.c.bf16 %v1582_v6, %v1582_v6  ;;  %v644_v16 = vsel %vm628_vm3, %v436_v43, %v612_v11  ;;  %v215_v43 = vpack.c.bf16 %v188_v62, %v188_v62  ;;  %v178_v60 = vpop.f32.mrf.mxu0  ;;  %v406_v62 = vunpack.c.l.bf16 %v318_v26 }
  0xea   :  { %v740_v18 = vunpack.c.l.b16 %v644_v16  ;;  %v392_v48 = vunpack.c.l.bf16 %v216_v37  ;;  %v211_v11 = vpack.c.bf16 %v178_v60, %v178_v60  ;;  %v208_v16 = vpack.c.bf16 %v1968_v2, %v1968_v2 }
  0xeb   :  { %v581_v9 = vunpack.c.l.bf16 %v565_v8  ;;  %v391_v55 = vunpack.c.l.bf16 %v215_v43  ;;  %v401_v20 = vunpack.c.l.bf16 %v273_v5  ;;  %v385_v43 = vunpack.c.l.bf16 %v209_v21 }
  0xec   :  { %v424_v0 = vadd.f32 %v408_v44, %v392_v48  ;;  %v387_v2 = vunpack.c.l.bf16 %v211_v11  ;;  %v413_v48 = vunpack.c.l.bf16 %v381_v3 }
  0xed   :  { %v1484_v13 = vadd.f32 -1.0, %v581_v9  ;;  %v423_v8 = vadd.f32 %v407_v51, %v391_v55  ;;  %v210_v9 = vpack.c.bf16 %v176_v23, %v176_v23 }
  0xee   :  { %v419_v47 = vadd.f32 %v403_v7, %v387_v2 }
  0xef   :  { %v193_v14 = vpop.f32.mrf.mxu2  ;;  %v613_v15 = vpack.c.bf16 %v1484_v13, %v1484_v13  ;;  %v2009_v30 = vpack.c.bf16 %v423_v8, %v423_v8  ;;  %v386_v33 = vunpack.c.l.bf16 %v210_v9 }
  0xf0   :  { %v217_v34 = vpack.c.bf16 %v193_v14, %v193_v14  ;;  %v2035_v63 = vpack.c.bf16 %v419_v47, %v419_v47 }
  0xf1   :  { %v645_v17 = vsel %vm629_vm4, %v437_v53, %v613_v15  ;;  %v241_v53 = vpop.permute.xlu2 %240  ;;  %v455_v26 = vunpack.c.l.bf16 %v2009_v30  ;;  %v418_v28 = vadd.f32 %v402_v12, %v386_v33 }
  0xf2   :  { %v741_v19 = vunpack.c.l.b16 %v645_v17  ;;  %v393_v46 = vunpack.c.l.bf16 %v217_v34  ;;  %v246_v59 = vperm.slane %v241_v53, %v1956_v31  ;;  %v422_v17 = vadd.f32 %v406_v62, %v390_v54 }
  0xf3   :  { %v2033_v62 = vpack.c.bf16 %v418_v28, %v418_v28  ;;  %vm2120_vm14 = vcmp.gt.f32.partialorder %v455_v26, 0.0 }
  0xf4   :  { %v1973_v22 = vpack.c.b16 %v741_v19, %v740_v18  ;;  %v425_v32 = vadd.f32 %v409_v45, %v393_v46  ;;  %v398_v13 = vunpack.c.l.bf16 %v246_v59  ;;  %v2000_v18 = vpack.c.bf16 %v424_v0, %v424_v0  ;;  %vm631_vm3 = vmpackc.low %vm2120_vm14, %vm2120_vm14 }
  0xf5   :  { %v400_v19 = vunpack.c.l.bf16 %v264_v4  ;;  %v2014_v10 = vpack.c.bf16 %v422_v17, %v422_v17  ;;  %v417_v59 = vadd.f32 %v401_v20, %v385_v43  ;;  %v450_v17 = vunpack.c.l.bf16 %v2033_v62 }
  0xf6   :  { %v1996_v14 = vpack.c.bf16 %v425_v32, %v425_v32  ;;  %v456_v40 = vunpack.c.l.bf16 %v2000_v18 }
  0xf7   :  { %v196_v29 = vpop.f32.mrf.mxu2  ;;  %v454_v53 = vunpack.c.l.bf16 %v2014_v10  ;;  %v2042_v11 = vpack.c.bf16 %v417_v59, %v417_v59 }
  0xf8   :  { %v218_v35 = vpack.c.bf16 %v196_v29, %v196_v29  ;;  %v206_v29 = vpack.c.bf16 %v1962_v42, %v1962_v42  ;;  %v488_v56 = vmin.f32 %v456_v40, 0.0  ;;  %vm2127_vm15 = vcmp.gt.f32.partialorder %v456_v40, 0.0 }
  0xf9   :  { %vm632_vm1 = vmpackc.low %vm2127_vm15, %vm2127_vm15  ;;  %vm2141_vm2 = vcmp.gt.f32.partialorder %v454_v53, 0.0 }
  0xfa   :  { %v394_v39 = vunpack.c.l.bf16 %v218_v35  ;;  %v255_v35 = vperm.slane %v250_v24, %v1956_v31  ;;  %v382_v46 = vunpack.c.l.bf16 %v206_v29  ;;  %v504_v7 = vpack.c.bf16 %v488_v56, %v488_v56  ;;  %vm630_vm4 = vmpackc.low %vm2141_vm2, %vm2141_vm2 }
  0xfc   :  { %v426_v49 = vadd.f32 %v410_v36, %v394_v39  ;;  %v457_v36 = vunpack.c.l.bf16 %v1996_v14  ;;  %v384_v39 = vunpack.c.l.bf16 %v208_v16  ;;  %v414_v32 = vadd.f32 %v398_v13, %v382_v46 }
  0xfe   :  { %v1990_v1 = vpack.c.bf16 %v426_v49, %v426_v49  ;;  %v489_v49 = vmin.f32 %v457_v36, 0.0  ;;  %v416_v52 = vadd.f32 %v400_v19, %v384_v39  ;;  %v451_v19 = vunpack.c.l.bf16 %v2035_v63 }
  0xff   :  { %v198_v57 = vpop.f32.mrf.mxu2  ;;  %v449_v39 = vunpack.c.l.bf16 %v2042_v11  ;;  %vm2109_vm12 = vcmp.gt.f32.partialorder %v457_v36, 0.0 }
 0x100   :  { %v219_v61 = vpack.c.bf16 %v198_v57, %v198_v57  ;;  %v458_v27 = vunpack.c.l.bf16 %v1990_v1  ;;  %v399_v57 = vunpack.c.l.bf16 %v255_v35  ;;  %v505_v54 = vpack.c.bf16 %v489_v49, %v489_v49  ;;  %vm633_vm0 = vmpackc.low %vm2109_vm12, %vm2109_vm12 }
 0x101   :  { %v2038_v5 = vpack.c.bf16 %v416_v52, %v416_v52  ;;  %v483_v46 = vmin.f32 %v451_v19, 0.0  ;;  %v481_v56 = vmin.f32 %v449_v39, 0.0 }
 0x102   :  { %v395_v6 = vunpack.c.l.bf16 %v219_v61  ;;  %v490_v42 = vmin.f32 %v458_v27, 0.0  ;;  %v487_v61 = vmin.f32 %v455_v26, 0.0  ;;  %v415_v9 = vadd.f32 %v399_v57, %v383_v58 }
 0x103   :  { %v521_v20 = vunpack.c.l.bf16 %v505_v54  ;;  %v448_v33 = vunpack.c.l.bf16 %v2038_v5  ;;  %vm2096_vm9 = vcmp.gt.f32.partialorder %v458_v27, 0.0 }
 0x104   :  { %v427_v15 = vadd.f32 %v411_v25, %v395_v6  ;;  %v506_v55 = vpack.c.bf16 %v490_v42, %v490_v42  ;;  %v486_v6 = vmin.f32 %v454_v53, 0.0  ;;  %v503_v16 = vpack.c.bf16 %v487_v61, %v487_v61  ;;  %vm634_vm13 = vmpackc.low %vm2096_vm9, %vm2096_vm9 }
 0x105   :  { %v548_v28 = vmul.f32 1.442695, %v521_v20  ;;  %v480_v49 = vmin.f32 %v448_v33, 0.0  ;;  %vm2173_vm9 = vcmp.gt.f32.partialorder %v448_v33, 0.0 }
 0x106   :  { %v2005_v23 = vpack.c.bf16 %v427_v15, %v427_v15  ;;  %v522_v8 = vunpack.c.l.bf16 %v506_v55  ;;  %v2046_v15 = vpack.c.bf16 %v414_v32, %v414_v32  ;;  %v502_v2 = vpack.c.bf16 %v486_v6, %v486_v6 }
 0x107   :  { %v201_v34 = vpop.f32.mrf.mxu2  ;;  %v499_v32 = vpack.c.bf16 %v483_v46, %v483_v46  ;;  %v497_v6 = vpack.c.bf16 %v481_v56, %v481_v56 }
 0x108   :  { %v459_v37 = vunpack.c.l.bf16 %v2005_v23  ;;  %v220_v38 = vpack.c.bf16 %v201_v34, %v201_v34  ;;  %v520_v34 = vunpack.c.l.bf16 %v504_v7  ;;  %v550_v35 = vmul.f32 1.442695, %v522_v8 }
 0x109   :  { %v446_v43 = vunpack.c.l.bf16 %v2046_v15 }
 0x10a   :  { %v491_v44 = vmin.f32 %v459_v37, 0.0  ;;  %v396_v45 = vunpack.c.l.bf16 %v220_v38  ;;  %v2051_v38 = vpack.c.bf16 %v415_v9, %v415_v9  ;;  %vm2081_vm6 = vcmp.gt.f32.partialorder %v459_v37, 0.0 }
 0x10b   :  { %v478_v59 = vmin.f32 %v446_v43, 0.0  ;;  %vm635_vm10 = vmpackc.low %vm2081_vm6, %vm2081_vm6  ;;  %vm2161_vm6 = vcmp.gt.f32.partialorder %v451_v19, 0.0 }
 0x10c   :  { %v507_v25 = vpack.c.bf16 %v491_v44, %v491_v44  ;;  %v428_v51 = vadd.f32 %v412_v50, %v396_v45  ;;  %v519_v44 = vunpack.c.l.bf16 %v503_v16  ;;  %v482_v45 = vmin.f32 %v450_v17, 0.0 }
 0x10d   :  { %v447_v52 = vunpack.c.l.bf16 %v2051_v38  ;;  %v515_v16 = vunpack.c.l.bf16 %v499_v32 }
 0x10e   :  { %v2029_v60 = vpack.c.bf16 %v428_v51, %v428_v51  ;;  %v523_v0 = vunpack.c.l.bf16 %v507_v25  ;;  %v518_v25 = vunpack.c.l.bf16 %v502_v2  ;;  %v546_v51 = vmul.f32 1.442695, %v520_v34 }
 0x10f   :  { %v203_v50 = vpop.f32.mrf.mxu2  ;;  %v544_v57 = vmul.f32 1.442695, %v519_v44  ;;  %v498_v58 = vpack.c.bf16 %v482_v45, %v482_v45  ;;  %vm2199_vm14 = vcmp.gt.f32.partialorder %v447_v52, 0.0 }
 0x110   :  { %v460_v3 = vunpack.c.l.bf16 %v2029_v60  ;;  %v221_v4 = vpack.c.bf16 %v203_v50, %v203_v50  ;;  %v552_v21 = vmul.f32 1.442695, %v523_v0  ;;  %v496_v50 = vpack.c.bf16 %v480_v49, %v480_v49 }
 0x111   :  { %v542_v54 = vmul.f32 1.442695, %v518_v25  ;;  %v514_v9 = vunpack.c.l.bf16 %v498_v58 }
 0x112   :  { %v492_v12 = vmin.f32 %v460_v3, 0.0  ;;  %v397_v13 = vunpack.c.l.bf16 %v221_v4  ;;  %1583 = vpow2.f32 %v552_v21  ;;  %v479_v4 = vmin.f32 %v447_v52, 0.0 }
 0x113   :  { %1585 = vpow2.f32 %v550_v35  ;;  %v512_v21 = vunpack.c.l.bf16 %v496_v50  ;;  %v513_v35 = vunpack.c.l.bf16 %v497_v6  ;;  %v534_v44 = vmul.f32 1.442695, %v514_v9 }
 0x114   :  { %v508_v24 = vpack.c.bf16 %v492_v12, %v492_v12  ;;  %v429_v29 = vadd.f32 %v413_v48, %v397_v13  ;;  %v494_v13 = vpack.c.bf16 %v478_v59, %v478_v59  ;;  %v495_v34 = vpack.c.bf16 %v479_v4, %v479_v4 }
 0x115   :  { %v530_v25 = vmul.f32 1.442695, %v512_v21  ;;  %vm2075_vm5 = vcmp.gt.f32.partialorder %v460_v3, 0.0 }
 0x116   :  { %v524_v42 = vunpack.c.l.bf16 %v508_v24  ;;  %v2054_v41 = vpack.c.bf16 %v429_v29, %v429_v29  ;;  %vm636_vm8 = vmpackc.low %vm2075_vm5, %vm2075_vm5  ;;  %vm2154_vm5 = vcmp.gt.f32.partialorder %v450_v17, 0.0 }
 0x118   :  { %v554_v47 = vmul.f32 1.442695, %v524_v42  ;;  %v461_v48 = vunpack.c.l.bf16 %v2054_v41  ;;  %v1584_v0 = vpop.eup %1583 }
 0x119   :  { %v1586_v8 = vpop.eup %1585  ;;  %v571_v29 = vpack.c.bf16 %v1584_v0, %v1584_v0 }
 0x11a   :  { %1587 = vpow2.f32 %v554_v47  ;;  %v493_v55 = vmin.f32 %v461_v48, 0.0  ;;  %v570_v46 = vpack.c.bf16 %v1586_v8, %v1586_v8  ;;  %v536_v47 = vmul.f32 1.442695, %v515_v16 }
 0x11b   :  { %1589 = vpow2.f32 %v548_v28  ;;  %v510_v28 = vunpack.c.l.bf16 %v494_v13  ;;  %vm2087_vm7 = vcmp.gt.f32.partialorder %v461_v48, 0.0 }
 0x11c   :  { %v509_v61 = vpack.c.bf16 %v493_v55, %v493_v55  ;;  %1591 = vpow2.f32 %v546_v51  ;;  %v587_v51 = vunpack.c.l.bf16 %v571_v29  ;;  %v511_v55 = vunpack.c.l.bf16 %v495_v34  ;;  %vm637_vm11 = vmpackc.low %vm2087_vm7, %vm2087_vm7 }
 0x11d   :  { %1593 = vpow2.f32 %v544_v57  ;;  %v532_v57 = vmul.f32 1.442695, %v513_v35  ;;  %vm626_vm7 = vmpackc.low %vm2154_vm5, %vm2154_vm5 }
 0x11e   :  { %v525_v7 = vunpack.c.l.bf16 %v509_v61  ;;  %1595 = vpow2.f32 %v542_v54  ;;  %v586_v61 = vunpack.c.l.bf16 %v570_v46  ;;  %v526_v54 = vmul.f32 1.442695, %v510_v28 }
 0x11f   :  { %v1490_v6 = vadd.f32 -1.0, %v587_v51  ;;  %v528_v8 = vmul.f32 1.442695, %v511_v55 }
 0x120   :  { %v1588_v12 = vpop.eup %1587  ;;  %v556_v20 = vmul.f32 1.442695, %v525_v7  ;;  %v1489_v21 = vadd.f32 -1.0, %v586_v61 }
 0x121   :  { %v572_v24 = vpack.c.bf16 %v1588_v12, %v1588_v12  ;;  %v1590_v2 = vpop.eup %1589  ;;  %v619_v35 = vpack.c.bf16 %v1490_v6, %v1490_v6 }
 0x122   :  { %1597 = vpow2.f32 %v556_v20  ;;  %v1592_v42 = vpop.eup %1591  ;;  %v569_v56 = vpack.c.bf16 %v1590_v2, %v1590_v2 }
 0x123   :  { %v588_v45 = vunpack.c.l.bf16 %v572_v24  ;;  %v1594_v49 = vpop.eup %1593  ;;  %v568_v58 = vpack.c.bf16 %v1592_v42, %v1592_v42  ;;  %1599 = vpow2.f32 %v534_v44  ;;  %v651_v55 = vsel %vm635_vm10, %v2005_v23, %v619_v35 }
 0x124   :  { %v1596_v59 = vpop.eup %1595  ;;  %1601 = vpow2.f32 %v536_v47  ;;  %v567_v0 = vpack.c.bf16 %v1594_v49, %v1594_v49  ;;  %v585_v7 = vunpack.c.l.bf16 %v569_v56  ;;  %v618_v47 = vpack.c.bf16 %v1489_v21, %v1489_v21 }
 0x125   :  { %v1491_v32 = vadd.f32 -1.0, %v588_v45  ;;  %1603 = vpow2.f32 %v530_v25  ;;  %v584_v9 = vunpack.c.l.bf16 %v568_v58  ;;  %v566_v12 = vpack.c.bf16 %v1596_v59, %v1596_v59 }
 0x126   :  { %1605 = vpow2.f32 %v532_v57  ;;  %v583_v29 = vunpack.c.l.bf16 %v567_v0  ;;  %v1488_v42 = vadd.f32 -1.0, %v585_v7  ;;  %v747_v6 = vunpack.c.l.b16 %v651_v55 }
 0x127   :  { %v620_v20 = vpack.c.bf16 %v1491_v32, %v1491_v32  ;;  %1607 = vpow2.f32 %v526_v54  ;;  %v582_v45 = vunpack.c.l.bf16 %v566_v12  ;;  %v1487_v49 = vadd.f32 -1.0, %v584_v9 }
 0x128   :  { %v1598_v50 = vpop.eup %1597  ;;  %1609 = vpow2.f32 %v528_v8  ;;  %v1486_v51 = vadd.f32 -1.0, %v583_v29  ;;  %v617_v57 = vpack.c.bf16 %v1488_v42, %v1488_v42  ;;  %vm2179_vm10 = vcmp.gt.f32.partialorder %v449_v39, 0.0 }
 0x129   :  { %v573_v4 = vpack.c.bf16 %v1598_v50, %v1598_v50  ;;  %v1600_v2 = vpop.eup %1599  ;;  %v652_v28 = vsel %vm636_vm8, %v2029_v60, %v620_v20  ;;  %v650_v50 = vsel %vm634_vm13, %v1990_v1, %v618_v47  ;;  %v1485_v54 = vadd.f32 -1.0, %v582_v45  ;;  %vm627_vm8 = vmpackc.low %vm2161_vm6, %vm2161_vm6 }
 0x12a   :  { %v1602_v44 = vpop.eup %1601  ;;  %v562_v56 = vpack.c.bf16 %v1600_v2, %v1600_v2  ;;  %v748_v32 = vunpack.c.l.b16 %v652_v28  ;;  %v649_v8 = vsel %vm633_vm0, %v1996_v14, %v617_v57  ;;  %v615_v1 = vpack.c.bf16 %v1486_v51, %v1486_v51  ;;  %vm625_vm12 = vmpackc.low %vm2179_vm10, %vm2179_vm10 }
 0x12b   :  { %v589_v16 = vunpack.c.l.bf16 %v573_v4  ;;  %v1604_v48 = vpop.eup %1603  ;;  %v563_v58 = vpack.c.bf16 %v1602_v44, %v1602_v44  ;;  %v746_v40 = vunpack.c.l.b16 %v650_v50  ;;  %v614_v20 = vpack.c.bf16 %v1485_v54, %v1485_v54  ;;  %vm623_vm0 = vmpackc.low %vm2199_vm14, %vm2199_vm14 }
 0x12c   :  { %v1606_v25 = vpop.eup %1605  ;;  %v560_v26 = vpack.c.bf16 %v1604_v48, %v1604_v48  ;;  %v578_v9 = vunpack.c.l.bf16 %v562_v56  ;;  %v745_v24 = vunpack.c.l.b16 %v649_v8  ;;  %v647_v34 = vsel %vm631_vm3, %v2009_v30, %v615_v1  ;;  %v1553_v8 = vld [vmem:[%s2538_s3 + $0x20] sm:$0xff]  ;;  %v859_v1 = vpop.permute.xlu2 %858 }
 0x12d   :  { %v1492_v3 = vadd.f32 -1.0, %v589_v16  ;;  %v1608_v59 = vpop.eup %1607  ;;  %v561_v7 = vpack.c.bf16 %v1606_v25, %v1606_v25  ;;  %v579_v12 = vunpack.c.l.bf16 %v563_v58  ;;  %v756_v21 = vpack.c.b16 %v747_v6, %v746_v40  ;;  %v1551_v6 = vld [vmem:[%s2538_s3 + $0x10] sm:$0xff] }
 0x12e   :  { %v1610_v0 = vpop.eup %1609  ;;  %v558_v14 = vpack.c.bf16 %v1608_v59, %v1608_v59  ;;  %v576_v29 = vunpack.c.l.bf16 %v560_v26  ;;  %v646_v44 = vsel %vm630_vm4, %v2014_v10, %v614_v20  ;;  %v743_v45 = vunpack.c.l.b16 %v647_v34  ;;  %v1556_v26 = vld [vmem:[%s2538_s3 + $0x38] sm:$0xff]  ;;  %v868_v20 = vpop.permute.xlu0 %867 }
 0x12f   :  { %v621_v46 = vpack.c.bf16 %v1492_v3, %v1492_v3  ;;  %v559_v2 = vpack.c.bf16 %v1610_v0, %v1610_v0  ;;  %v1481_v3 = vadd.f32 -1.0, %v578_v9  ;;  %v577_v35 = vunpack.c.l.bf16 %v561_v7  ;;  %v1552_v7 = vld [vmem:[%s2538_s3 + $0x18] sm:$0xff] }
 0x130   :  { %v574_v48 = vunpack.c.l.bf16 %v558_v14  ;;  %v1479_v17 = vadd.f32 -1.0, %v576_v29  ;;  %v742_v10 = vunpack.c.l.b16 %v646_v44  ;;  %vm2193_vm13 = vcmp.gt.f32.partialorder %v446_v43, 0.0 }
 0x131   :  { %v653_v60 = vsel %vm637_vm11, %v2054_v41, %v621_v46  ;;  %v616_v41 = vpack.c.bf16 %v1487_v49, %v1487_v49  ;;  %v575_v46 = vunpack.c.l.bf16 %v559_v2  ;;  %v610_v28 = vpack.c.bf16 %v1481_v3, %v1481_v3  ;;  %vm624_vm11 = vmpackc.low %vm2173_vm9, %vm2173_vm9 }
 0x132   :  { %v749_v61 = vunpack.c.l.b16 %v653_v60  ;;  %v1480_v49 = vadd.f32 -1.0, %v577_v35  ;;  %v754_v27 = vpack.c.b16 %v743_v45, %v742_v10  ;;  %v1477_v51 = vadd.f32 -1.0, %v574_v48  ;;  %vm622_vm15 = vmpackc.low %vm2193_vm13, %vm2193_vm13 }
 0x133   :  { %v648_v13 = vsel %vm632_vm1, %v2000_v18, %v616_v41  ;;  %v1482_v18 = vadd.f32 -1.0, %v579_v12  ;;  %v1478_v56 = vadd.f32 -1.0, %v575_v46  ;;  %v642_v60 = vsel %vm626_vm7, %v2033_v62, %v610_v28  ;;  %v850_v12 = vpop.permute.xlu1 %849 }
 0x134   :  { %v757_v4 = vpack.c.b16 %v749_v61, %v748_v32  ;;  %v744_v53 = vunpack.c.l.b16 %v648_v13  ;;  %v608_v57 = vpack.c.bf16 %v1479_v17, %v1479_v17  ;;  %v609_v58 = vpack.c.bf16 %v1480_v49, %v1480_v49  ;;  %v886_v40 = vpop.permute.xlu2 %885 }
 0x135   :  { %v611_v47 = vpack.c.bf16 %v1482_v18, %v1482_v18  ;;  %v606_v61 = vpack.c.bf16 %v1477_v51, %v1477_v51  ;;  %v607_v36 = vpack.c.bf16 %v1478_v56, %v1478_v56  ;;  %v855_v29 = vperm.slane %v850_v12, %v1956_v31 }
 0x136   :  { %766 = vmatpush.bf16.msra.mxu1 %v757_v4  ;;  %1565 = vmatpush.bf16.msra.mxu3 %v757_v4  ;;  %v755_v37 = vpack.c.b16 %v745_v24, %v744_v53  ;;  %v640_v59 = vsel %vm624_vm11, %v2038_v5, %v608_v57  ;;  %v641_v32 = vsel %vm625_vm12, %v2042_v11, %v609_v58  ;;  %v1554_v4 = vld [vmem:[%s2538_s3 + $0x28] sm:$0xff]  ;;  %v2242_v35 = vpop.permute.xlu0 %894 }
 0x137   :  { %v643_v55 = vsel %vm627_vm8, %v2035_v63, %v611_v47  ;;  %v738_v63 = vunpack.c.l.b16 %v642_v60  ;;  %v736_v52 = vunpack.c.l.b16 %v640_v59  ;;  %v737_v50 = vunpack.c.l.b16 %v641_v32 }
 0x138   :  { %v739_v39 = vunpack.c.l.b16 %v643_v55  ;;  %v638_v5 = vsel %vm622_vm15, %v2046_v15, %v606_v61  ;;  %v639_v11 = vsel %vm623_vm0, %v2051_v38, %v607_v36  ;;  %v1550_v15 = vld [vmem:[%s2538_s3 + $0x8] sm:$0xff]  ;;  %v1555_v38 = vld [vmem:[%s2538_s3 + $0x30] sm:$0xff]  ;;  %v1007_v18 = vunpack.c.l.bf16 %v855_v29 }
 0x139   :  { %v751_v23 = vpack.c.b16 %v737_v50, %v736_v52  ;;  %v734_v41 = vunpack.c.l.b16 %v638_v5  ;;  %v735_v54 = vunpack.c.l.b16 %v639_v11  ;;  %v864_v45 = vperm.slane %v859_v1, %v1956_v31 }
 0x13a   :  { %767 = vmatpush.bf16.msra.mxu1 %v756_v21  ;;  %1566 = vmatpush.bf16.msra.mxu3 %v756_v21  ;;  %v752_v43 = vpack.c.b16 %v739_v39, %v738_v63  ;;  %v873_v10 = vperm.slane %v868_v20, %v1956_v31  ;;  %v891_v52 = vperm.slane %v886_v40, %v1956_v31 }
 0x13b   :  { %v750_v0 = vpack.c.b16 %v735_v54, %v734_v41  ;;  %v877_v14 = vpop.permute.xlu1 %876  ;;  %v1008_v25 = vunpack.c.l.bf16 %v864_v45  ;;  %v900_v20 = vperm.slane %v2242_v35, %v1956_v31 }
 0x13c   :  { %v2240_v2 = vpop.permute.xlu2 %912  ;;  %v882_v60 = vperm.slane %v877_v14, %v1956_v31  ;;  %v1009_v62 = vunpack.c.l.bf16 %v873_v10 }
 0x13d   :  { %v918_v45 = vperm.slane %v2240_v2, %v1956_v31 }
 0x13e   :  { %768 = vmatpush.bf16.msra.mxu1 %v755_v37  ;;  %1567 = vmatpush.bf16.msra.mxu3 %v755_v37  ;;  %v1010_v36 = vunpack.c.l.bf16 %v882_v60 }
 0x142   :  { %769 = vmatpush.bf16.msra.mxu1 %v754_v27  ;;  %1568 = vmatpush.bf16.msra.mxu3 %v754_v27  ;;  %v2253_v27 = vpop.permute.xlu0 %921 }
 0x143   :  { %v2244_v53 = vpop.permute.xlu1 %903  ;;  %v927_v60 = vperm.slane %v2253_v27, %v1956_v31 }
 0x144   :  { %v940_v28 = vpop.permute.xlu2 %939 }
 0x145   :  { %v945_v17 = vperm.slane %v940_v28, %v1956_v31 }
 0x146   :  { %770 = vmatpush.bf16.msra.mxu1 %v1973_v22  ;;  %1569 = vmatpush.bf16.msra.mxu3 %v1973_v22  ;;  %v1549_v22 = vld [vmem:[%s2538_s3] sm:$0xff] }
 0x147   :  { %v1017_v58 = vunpack.c.l.bf16 %v945_v17 }
 0x14a   :  { %771 = vmatpush.bf16.msra.mxu1 %v752_v43  ;;  %1570 = vmatpush.bf16.msra.mxu3 %v752_v43 }
 0x14b   :  { %v2257_v57 = vpop.permute.xlu1 %930 }
 0x14e   :  { %772 = vmatpush.bf16.msra.mxu1 %v751_v23  ;;  %1571 = vmatpush.bf16.msra.mxu3 %v751_v23 }
 0x152   :  { %773 = vmatpush.bf16.msra.mxu1 %v750_v0  ;;  %1572 = vmatpush.bf16.msra.mxu3 %v750_v0 }
 0x153   :  { %v958_v12 = vpop.permute.xlu1 %957 }
 0x155   :  { %774 = vmatmul.bf16.vlgmr.msra.gmra.mxu1 %v1549_v22  ;;  %799 = vmatmul.bf16.vlgmr.msra.gmra.mxu3 %v1554_v4  ;;  %v1011_v22 = vunpack.c.l.bf16 %v891_v52  ;;  %v949_v4 = vpop.permute.xlu0 %948 }
 0x165   :  { %779 = vmatmul.bf16.gmra.mxu1 %v1550_v15  ;;  %804 = vmatmul.bf16.gmra.mxu3 %v1555_v38 }
 0x175   :  { %784 = vmatmul.bf16.gmra.mxu1 %v1551_v6  ;;  %809 = vmatmul.bf16.gmra.mxu3 %v1556_v26  ;;  %v954_v6 = vperm.slane %v949_v4, %v1956_v31 }
 0x185   :  { %789 = vmatmul.bf16.gmra.mxu1 %v1552_v7 }
 0x195   :  { %794 = vmatmul.bf16.gmra.mxu1 %v1553_v8 }
 0x1d2   :  { %v775_v9 = vpop.f32.mrf.mxu1 }
 0x1d3   :  { %v815_v21 = vpack.c.bf16 %v775_v9, %v775_v9 }
 0x1d5   :  { %v991_v3 = vunpack.c.l.bf16 %v815_v21 }
 0x1d7   :  { %v1023_v42 = vadd.f32 %v1007_v18, %v991_v3 }
 0x1d8   :  { %v800_v13 = vpop.f32.mrf.mxu3 }
 0x1d9   :  { %v2249_v48 = vpack.c.bf16 %v1023_v42, %v1023_v42  ;;  %v825_v46 = vpack.c.bf16 %v800_v13, %v800_v13 }
 0x1da   :  { %v777_v16 = vpop.f32.mrf.mxu1 }
 0x1db   :  { %v816_v30 = vpack.c.bf16 %v777_v16, %v777_v16  ;;  %v1055_v51 = vunpack.c.l.bf16 %v2249_v48  ;;  %v1001_v56 = vunpack.c.l.bf16 %v825_v46 }
 0x1dd   :  { %v992_v49 = vunpack.c.l.bf16 %v816_v30  ;;  %v1087_v32 = vmin.f32 %v1055_v51, 0.0  ;;  %v1033_v61 = vadd.f32 %v1017_v58, %v1001_v56  ;;  %vm2348_vm1 = vcmp.gt.f32.partialorder %v1055_v51, 0.0 }
 0x1de   :  { %vm1231_vm2 = vmpackc.low %vm2348_vm1, %vm2348_vm1 }
 0x1df   :  { %v1024_v33 = vadd.f32 %v1008_v25, %v992_v49  ;;  %v1103_v11 = vpack.c.bf16 %v1087_v32, %v1087_v32  ;;  %v2266_v23 = vpack.c.bf16 %v1033_v61, %v1033_v61  ;;  %v967_v25 = vpop.permute.xlu2 %966  ;;  %v985_v61 = vpop.permute.xlu1 %984 }
 0x1e0   :  { %v802_v24 = vpop.f32.mrf.mxu3 }
 0x1e1   :  { %v2264_v50 = vpack.c.bf16 %v1024_v33, %v1024_v33  ;;  %v826_v54 = vpack.c.bf16 %v802_v24, %v802_v24  ;;  %v1119_v8 = vunpack.c.l.bf16 %v1103_v11  ;;  %v1065_v1 = vunpack.c.l.bf16 %v2266_v23 }
 0x1e2   :  { %v780_v34 = vpop.f32.mrf.mxu1  ;;  %v1018_v24 = vunpack.c.l.bf16 %v954_v6  ;;  %v2304_v33 = vunpack.c.l.bf16 %v918_v45  ;;  %v990_v11 = vperm.slane %v985_v61, %v1956_v31 }
 0x1e3   :  { %v817_v47 = vpack.c.bf16 %v780_v34, %v780_v34  ;;  %v1056_v15 = vunpack.c.l.bf16 %v2264_v50  ;;  %v1002_v40 = vunpack.c.l.bf16 %v826_v54  ;;  %v909_v34 = vperm.slane %v2244_v53, %v1956_v31 }
 0x1e4   :  { %v1135_v3 = vmul.f32 1.442695, %v1119_v8  ;;  %v1097_v18 = vmin.f32 %v1065_v1, 0.0  ;;  %vm2458_vm0 = vcmp.gt.f32.partialorder %v1065_v1, 0.0 }
 0x1e5   :  { %v993_v55 = vunpack.c.l.bf16 %v817_v47  ;;  %v1088_v14 = vmin.f32 %v1056_v15, 0.0  ;;  %v1034_v30 = vadd.f32 %v1018_v24, %v1002_v40  ;;  %v963_v47 = vperm.slane %v958_v12, %v1956_v31 }
 0x1e6   :  { %1611 = vpow2.f32 %v1135_v3  ;;  %v1113_v56 = vpack.c.bf16 %v1097_v18, %v1097_v18  ;;  %vm2368_vm3 = vcmp.gt.f32.partialorder %v1056_v15, 0.0 }
 0x1e7   :  { %v1025_v43 = vadd.f32 %v1009_v62, %v993_v55  ;;  %v1104_v46 = vpack.c.bf16 %v1088_v14, %v1088_v14  ;;  %v972_v55 = vperm.slane %v967_v25, %v1956_v31  ;;  %v2302_v58 = vpack.c.bf16 %v1034_v30, %v1034_v30  ;;  %v976_v62 = vpop.permute.xlu0 %975  ;;  %vm1232_vm5 = vmpackc.low %vm2368_vm3, %vm2368_vm3 }
 0x1e8   :  { %v2246_v44 = vpop.f32.mrf.mxu3  ;;  %v1019_v32 = vunpack.c.l.bf16 %v963_v47  ;;  %v981_v27 = vperm.slane %v976_v62, %v1956_v31 }
 0x1e9   :  { %v2268_v0 = vpack.c.bf16 %v1025_v43, %v1025_v43  ;;  %v827_v53 = vpack.c.bf16 %v2246_v44, %v2246_v44  ;;  %v1066_v4 = vunpack.c.l.bf16 %v2302_v58 }
 0x1ea   :  { %v782_v37 = vpop.f32.mrf.mxu1  ;;  %v1021_v18 = vunpack.c.l.bf16 %v981_v27 }
 0x1eb   :  { %v818_v19 = vpack.c.bf16 %v782_v37, %v782_v37  ;;  %v1057_v13 = vunpack.c.l.bf16 %v2268_v0  ;;  %v1012_v37 = vunpack.c.l.bf16 %v900_v20 }
 0x1ed   :  { %v994_v63 = vunpack.c.l.bf16 %v818_v19  ;;  %v1089_v35 = vmin.f32 %v1057_v13, 0.0  ;;  %v1013_v19 = vunpack.c.l.bf16 %v909_v34  ;;  %vm2378_vm4 = vcmp.gt.f32.partialorder %v1057_v13, 0.0 }
 0x1ee   :  { %vm1233_vm7 = vmpackc.low %vm2378_vm4, %vm2378_vm4  ;;  %vm2481_vm4 = vcmp.gt.f32.partialorder %v1066_v4, 0.0 }
 0x1ef   :  { %v1026_v5 = vadd.f32 %v1010_v36, %v994_v63  ;;  %v1105_v44 = vpack.c.bf16 %v1089_v35, %v1089_v35  ;;  %v1120_v63 = vunpack.c.l.bf16 %v1104_v46  ;;  %v1003_v36 = vunpack.c.l.bf16 %v827_v53 }
 0x1f0   :  { %v2259_v39 = vpop.f32.mrf.mxu3 }
 0x1f1   :  { %v2272_v26 = vpack.c.bf16 %v1026_v5, %v1026_v5  ;;  %v828_v49 = vpack.c.bf16 %v2259_v39, %v2259_v39  ;;  %v1137_v8 = vmul.f32 1.442695, %v1120_v63  ;;  %v1035_v20 = vadd.f32 %v1019_v32, %v1003_v36 }
 0x1f2   :  { %v785_v59 = vpop.f32.mrf.mxu1 }
 0x1f3   :  { %v819_v41 = vpack.c.bf16 %v785_v59, %v785_v59  ;;  %v1058_v29 = vunpack.c.l.bf16 %v2272_v26  ;;  %v1004_v52 = vunpack.c.l.bf16 %v828_v49  ;;  %1613 = vpow2.f32 %v1137_v8 }
 0x1f4   :  { %v2318_v49 = vpack.c.bf16 %v1035_v20, %v1035_v20 }
 0x1f5   :  { %v995_v38 = vunpack.c.l.bf16 %v819_v41  ;;  %v1090_v17 = vmin.f32 %v1058_v29, 0.0  ;;  %v1129_v41 = vunpack.c.l.bf16 %v1113_v56  ;;  %vm2403_vm6 = vcmp.gt.f32.partialorder %v1058_v29, 0.0 }
 0x1f6   :  { %vm1234_vm9 = vmpackc.low %vm2403_vm6, %vm2403_vm6 }
 0x1f7   :  { %v1027_v9 = vadd.f32 %v1011_v22, %v995_v38  ;;  %v1106_v43 = vpack.c.bf16 %v1090_v17, %v1090_v17  ;;  %v1020_v22 = vunpack.c.l.bf16 %v972_v55  ;;  %v1121_v38 = vunpack.c.l.bf16 %v1105_v44  ;;  %vm1241_vm6 = vmpackc.low %vm2458_vm0, %vm2458_vm0 }
 0x1f8   :  { %v810_v16 = vpop.f32.mrf.mxu3 }
 0x1f9   :  { %v2280_v21 = vpack.c.bf16 %v1027_v9, %v1027_v9  ;;  %v829_v54 = vpack.c.bf16 %v810_v16, %v810_v16  ;;  %v1122_v14 = vunpack.c.l.bf16 %v1106_v43  ;;  %v1036_v24 = vadd.f32 %v1020_v22, %v1004_v52 }
 0x1fa   :  { %v787_v7 = vpop.f32.mrf.mxu1  ;;  %v1155_v16 = vmul.f32 1.442695, %v1129_v41  ;;  %v1139_v45 = vmul.f32 1.442695, %v1121_v38  ;;  %v1015_v43 = vunpack.c.l.bf16 %v927_v60  ;;  %v1067_v52 = vunpack.c.l.bf16 %v2318_v49 }
 0x1fb   :  { %v820_v42 = vpack.c.bf16 %v787_v7, %v787_v7  ;;  %v1059_v28 = vunpack.c.l.bf16 %v2280_v21  ;;  %v1612_v7 = vpop.eup %1611  ;;  %v1005_v30 = vunpack.c.l.bf16 %v829_v54  ;;  %v2320_v25 = vpack.c.bf16 %v1036_v24, %v1036_v24 }
 0x1fc   :  { %v1167_v35 = vpack.c.bf16 %v1612_v7, %v1612_v7  ;;  %1615 = vpow2.f32 %v1155_v16  ;;  %v936_v38 = vperm.slane %v2257_v57, %v1956_v31 }
 0x1fd   :  { %v996_v2 = vunpack.c.l.bf16 %v820_v42  ;;  %v1091_v39 = vmin.f32 %v1059_v28, 0.0  ;;  %v1022_v42 = vunpack.c.l.bf16 %v990_v11  ;;  %1617 = vpow2.f32 %v1139_v45  ;;  %v1614_v11 = vpop.eup %1613 }
 0x1fe   :  { %v1183_v62 = vunpack.c.l.bf16 %v1167_v35  ;;  %v1168_v24 = vpack.c.bf16 %v1614_v11, %v1614_v11  ;;  %vm2416_vm8 = vcmp.gt.f32.partialorder %v1059_v28, 0.0 }
 0x1ff   :  { %v1028_v59 = vadd.f32 %v1012_v37, %v996_v2  ;;  %v1107_v9 = vpack.c.bf16 %v1091_v39, %v1091_v39  ;;  %v1098_v37 = vmin.f32 %v1066_v4, 0.0  ;;  %v1037_v2 = vadd.f32 %v1021_v18, %v1005_v30  ;;  %vm1235_vm11 = vmpackc.low %vm2416_vm8, %vm2416_vm8 }
 0x200   :  { %v812_v5 = vpop.f32.mrf.mxu3  ;;  %v1525_v7 = vadd.f32 -1.0, %v1183_v62  ;;  %v1016_v30 = vunpack.c.l.bf16 %v936_v38  ;;  %vm1242_vm8 = vmpackc.low %vm2481_vm4, %vm2481_vm4 }
 0x201   :  { %v2311_v6 = vpack.c.bf16 %v1028_v59, %v1028_v59  ;;  %v830_v12 = vpack.c.bf16 %v812_v5, %v812_v5  ;;  %v1123_v47 = vunpack.c.l.bf16 %v1107_v9  ;;  %v1114_v63 = vpack.c.bf16 %v1098_v37, %v1098_v37 }
 0x202   :  { %v790_v10 = vpop.f32.mrf.mxu1  ;;  %v1068_v5 = vunpack.c.l.bf16 %v2320_v25  ;;  %v2326_v41 = vpack.c.bf16 %v1037_v2, %v1037_v2  ;;  %v2332_v9 = vpop.eup %1615  ;;  %v1215_v37 = vpack.c.bf16 %v1525_v7, %v1525_v7 }
 0x203   :  { %v821_v40 = vpack.c.bf16 %v790_v10, %v790_v10  ;;  %v1060_v34 = vunpack.c.l.bf16 %v2311_v6  ;;  %v1006_v53 = vunpack.c.l.bf16 %v830_v12  ;;  %v1141_v10 = vmul.f32 1.442695, %v1122_v14  ;;  %v1618_v14 = vpop.eup %1617 }
 0x204   :  { %v1143_v59 = vmul.f32 1.442695, %v1123_v47  ;;  %v1130_v8 = vunpack.c.l.bf16 %v1114_v63  ;;  %v1100_v31 = vmin.f32 %v1068_v5, 0.0  ;;  %v1169_v47 = vpack.c.bf16 %v1618_v14, %v1618_v14 }
 0x205   :  { %v1092_v46 = vmin.f32 %v1060_v34, 0.0  ;;  %v997_v17 = vunpack.c.l.bf16 %v821_v40  ;;  %v1038_v32 = vadd.f32 %v1022_v42, %v1006_v53  ;;  %1619 = vpow2.f32 %v1141_v10  ;;  %v2355_v10 = vpop.permute.xlu2 %1297 }
 0x206   :  { %1621 = vpow2.f32 %v1143_v59  ;;  %v1184_v63 = vunpack.c.l.bf16 %v1168_v24  ;;  %v2374_v38 = vsel %vm1231_vm2, %v2249_v48, %v1215_v37  ;;  %vm2426_vm10 = vcmp.gt.f32.partialorder %v1060_v34, 0.0 }
 0x207   :  { %v1108_v56 = vpack.c.bf16 %v1092_v46, %v1092_v46  ;;  %v1029_v55 = vadd.f32 %v1013_v19, %v997_v17  ;;  %v2334_v12 = vpack.c.bf16 %v1038_v32, %v1038_v32  ;;  %v1177_v46 = vpack.c.bf16 %v2332_v9, %v2332_v9  ;;  %vm1236_vm13 = vmpackc.low %vm2426_vm10, %vm2426_vm10 }
 0x208   :  { %v1526_v24 = vadd.f32 -1.0, %v1184_v63 }
 0x209   :  { %v1124_v39 = vunpack.c.l.bf16 %v1108_v56  ;;  %v2322_v61 = vpack.c.bf16 %v1029_v55, %v1029_v55  ;;  %v1070_v53 = vunpack.c.l.bf16 %v2334_v12  ;;  %v1157_v56 = vmul.f32 1.442695, %v1130_v8 }
 0x20a   :  { %v792_v3 = vpop.f32.mrf.mxu1  ;;  %v1185_v8 = vunpack.c.l.bf16 %v1169_v47  ;;  %v1216_v63 = vpack.c.bf16 %v1526_v24, %v1526_v24 }
 0x20b   :  { %v822_v44 = vpack.c.bf16 %v792_v3, %v792_v3  ;;  %v1145_v19 = vmul.f32 1.442695, %v1124_v39  ;;  %v1061_v54 = vunpack.c.l.bf16 %v2322_v61  ;;  %v1069_v3 = vunpack.c.l.bf16 %v2326_v41  ;;  %v1620_v16 = vpop.eup %1619 }
 0x20c   :  { %v1622_v62 = vpop.eup %1621  ;;  %v1116_v39 = vpack.c.bf16 %v1100_v31, %v1100_v31  ;;  %v1102_v15 = vmin.f32 %v1070_v53, 0.0  ;;  %v1527_v37 = vadd.f32 -1.0, %v1185_v8  ;;  %v2394_v8 = vunpack.c.l.bf16 %v1177_v46 }
 0x20d   :  { %v998_v36 = vunpack.c.l.bf16 %v822_v44  ;;  %v1093_v40 = vmin.f32 %v1061_v54, 0.0  ;;  %1623 = vpow2.f32 %v1145_v19  ;;  %v1101_v59 = vmin.f32 %v1069_v3, 0.0 }
 0x20e   :  { %v1171_v9 = vpack.c.bf16 %v1622_v62, %v1622_v62  ;;  %v1132_v48 = vunpack.c.l.bf16 %v1116_v39  ;;  %vm2437_vm12 = vcmp.gt.f32.partialorder %v1061_v54, 0.0 }
 0x20f   :  { %v1030_v22 = vadd.f32 %v2304_v33, %v998_v36  ;;  %v1099_v33 = vmin.f32 %v1067_v52, 0.0  ;;  %v1109_v18 = vpack.c.bf16 %v1093_v40, %v1093_v40  ;;  %vm1237_vm15 = vmpackc.low %vm2437_vm12, %vm2437_vm12  ;;  %vm1085_vm12 = vcmp.gt.f32.partialorder %v1069_v3, 0.0 }
 0x210   :  { %v1161_v39 = vmul.f32 1.442695, %v1132_v48 }
 0x211   :  { %v2338_v20 = vpack.c.bf16 %v1030_v22, %v1030_v22  ;;  %v1125_v17 = vunpack.c.l.bf16 %v1109_v18  ;;  %v1115_v2 = vpack.c.bf16 %v1099_v33, %v1099_v33  ;;  %v1117_v33 = vpack.c.bf16 %v1101_v59, %v1101_v59 }
 0x212   :  { %v795_v27 = vpop.f32.mrf.mxu1 }
 0x213   :  { %v823_v60 = vpack.c.bf16 %v795_v27, %v795_v27  ;;  %v1062_v42 = vunpack.c.l.bf16 %v2338_v20  ;;  %v1147_v32 = vmul.f32 1.442695, %v1125_v17  ;;  %v1624_v22 = vpop.eup %1623  ;;  %v2388_v17 = vpop.permute.xlu1 %1307  ;;  %v1133_v59 = vunpack.c.l.bf16 %v1117_v33 }
 0x214   :  { %v1172_v18 = vpack.c.bf16 %v1624_v22, %v1624_v22 }
 0x215   :  { %v999_v57 = vunpack.c.l.bf16 %v823_v60  ;;  %v1094_v55 = vmin.f32 %v1062_v42, 0.0  ;;  %1625 = vpow2.f32 %v1147_v32  ;;  %v1131_v60 = vunpack.c.l.bf16 %v1115_v2 }
 0x216   :  { %1627 = vpow2.f32 %v1157_v56  ;;  %v1163_v48 = vmul.f32 1.442695, %v1133_v59  ;;  %vm2448_vm14 = vcmp.gt.f32.partialorder %v1062_v42, 0.0 }
 0x217   :  { %v1031_v45 = vadd.f32 %v1015_v43, %v999_v57  ;;  %v1170_v43 = vpack.c.bf16 %v1620_v16, %v1620_v16  ;;  %v1110_v27 = vpack.c.bf16 %v1094_v55, %v1094_v55  ;;  %v2386_v57 = vpop.permute.xlu0 %1302  ;;  %v1159_v2 = vmul.f32 1.442695, %v1131_v60  ;;  %vm1238_vm2 = vmpackc.low %vm2448_vm14, %vm2448_vm14 }
 0x218   :  { %v1187_v55 = vunpack.c.l.bf16 %v1171_v9  ;;  %v1263_v9 = vunpack.c.l.bf16 %v2374_v38  ;;  %vm1086_vm14 = vcmp.gt.f32.partialorder %v1070_v53, 0.0 }
 0x219   :  { %v2359_v51 = vpack.c.bf16 %v1031_v45, %v1031_v45  ;;  %v1126_v40 = vunpack.c.l.bf16 %v1110_v27  ;;  %v1186_v13 = vunpack.c.l.bf16 %v1170_v43  ;;  %v1118_v45 = vpack.c.bf16 %v1102_v15, %v1102_v15  ;;  %v2392_v43 = vpop.permute.xlu2 %1312  ;;  %vm1246_vm0 = vmpackc.low %vm1086_vm14, %vm1086_vm14 }
 0x21a   :  { %v797_v44 = vpop.f32.mrf.mxu1 }
 0x21b   :  { %v1063_v11 = vunpack.c.l.bf16 %v2359_v51  ;;  %v824_v19 = vpack.c.bf16 %v797_v44, %v797_v44  ;;  %v1149_v16 = vmul.f32 1.442695, %v1126_v40  ;;  %v1626_v62 = vpop.eup %1625  ;;  %v1528_v27 = vadd.f32 -1.0, %v1186_v13 }
 0x21c   :  { %v1173_v56 = vpack.c.bf16 %v1626_v62, %v1626_v62  ;;  %v1134_v15 = vunpack.c.l.bf16 %v1118_v45  ;;  %v1529_v40 = vadd.f32 -1.0, %v1187_v55  ;;  %v1628_v24 = vpop.eup %1627  ;;  %v1323_v62 = vpop.permute.xlu1 %1322 }
 0x21d   :  { %v1095_v14 = vmin.f32 %v1063_v11, 0.0  ;;  %v1000_v31 = vunpack.c.l.bf16 %v824_v19  ;;  %1629 = vpow2.f32 %v1149_v16  ;;  %v1188_v19 = vunpack.c.l.bf16 %v1172_v18 }
 0x21e   :  { %v1218_v36 = vpack.c.bf16 %v1528_v27, %v1528_v27  ;;  %v1165_v29 = vmul.f32 1.442695, %v1134_v15  ;;  %v1178_v45 = vpack.c.bf16 %v1628_v24, %v1628_v24  ;;  %vm2465_vm1 = vcmp.gt.f32.partialorder %v1063_v11, 0.0 }
 0x21f   :  { %v1111_v35 = vpack.c.bf16 %v1095_v14, %v1095_v14  ;;  %v1032_v47 = vadd.f32 %v1016_v30, %v1000_v31  ;;  %v1217_v30 = vpack.c.bf16 %v1527_v37, %v1527_v37  ;;  %v1189_v14 = vunpack.c.l.bf16 %v1173_v56  ;;  %v1318_v37 = vpop.permute.xlu0 %1317  ;;  %vm1239_vm3 = vmpackc.low %vm2465_vm1, %vm2465_vm1 }
 0x220   :  { %v1248_v31 = vsel %vm1232_vm5, %v2264_v50, %v1216_v63  ;;  %v1530_v13 = vadd.f32 -1.0, %v1188_v19  ;;  %v1219_v50 = vpack.c.bf16 %v1529_v40, %v1529_v40 }
 0x221   :  { %v1127_v44 = vunpack.c.l.bf16 %v1111_v35  ;;  %v2390_v32 = vpack.c.bf16 %v1032_v47, %v1032_v47  ;;  %v1249_v18 = vsel %vm1233_vm7, %v2268_v0, %v1217_v30  ;;  %v1531_v7 = vadd.f32 -1.0, %v1189_v14  ;;  %v1328_v15 = vpop.permute.xlu2 %1327 }
 0x222   :  { %v1265_v63 = vunpack.c.l.bf16 %v1249_v18  ;;  %v1220_v59 = vpack.c.bf16 %v1530_v13, %v1530_v13  ;;  %v1251_v40 = vsel %vm1235_vm11, %v2280_v21, %v1219_v50  ;;  %v1535_v47 = vadd.f32 -1.0, %v2394_v8 }
 0x223   :  { %v1151_v22 = vmul.f32 1.442695, %v1127_v44  ;;  %v1064_v60 = vunpack.c.l.bf16 %v2390_v32  ;;  %v1630_v38 = vpop.eup %1629  ;;  %v1221_v14 = vpack.c.bf16 %v1531_v7, %v1531_v7  ;;  %vm2496_vm7 = vcmp.gt.f32.partialorder %v1067_v52, 0.0 }
 0x224   :  { %v1174_v16 = vpack.c.bf16 %v1630_v38, %v1630_v38  ;;  %v1194_v38 = vunpack.c.l.bf16 %v1178_v45  ;;  %vm1243_vm11 = vmpackc.low %vm2496_vm7, %vm2496_vm7 }
 0x225   :  { %1631 = vpow2.f32 %v1151_v22  ;;  %v1096_v33 = vmin.f32 %v1064_v60, 0.0  ;;  %v1253_v13 = vsel %vm1237_vm15, %v2322_v61, %v1221_v14  ;;  %vm2487_vm5 = vcmp.gt.f32.partialorder %v1064_v60, 0.0  ;;  %vm1245_vm15 = vmpackc.low %vm1085_vm12, %vm1085_vm12 }
 0x226   :  { %1633 = vpow2.f32 %v1159_v2  ;;  %v1264_v2 = vunpack.c.l.bf16 %v1248_v31  ;;  %v1190_v0 = vunpack.c.l.bf16 %v1174_v16  ;;  %v1267_v31 = vunpack.c.l.bf16 %v1251_v40  ;;  %vm1240_vm10 = vmpackc.low %vm2487_vm5, %vm2487_vm5 }
 0x227   :  { %1635 = vpow2.f32 %v1161_v39  ;;  %v1112_v35 = vpack.c.bf16 %v1096_v33, %v1096_v33  ;;  %v1250_v39 = vsel %vm1234_vm9, %v2272_v26, %v1218_v36  ;;  %v1375_v26 = vmul.f32 %v2355_v10, %v1263_v9  ;;  %v1333_v45 = vpop.permute.xlu0 %1332 }
 0x228   :  { %1637 = vpow2.f32 %v1163_v48  ;;  %v1532_v19 = vadd.f32 -1.0, %v1190_v0  ;;  %v1376_v24 = vmul.f32 %v2386_v57, %v1264_v2  ;;  %v1266_v46 = vunpack.c.l.bf16 %v1250_v39 }
 0x229   :  { %v1128_v55 = vunpack.c.l.bf16 %v1112_v35  ;;  %1639 = vpow2.f32 %v1165_v29  ;;  %v1252_v10 = vsel %vm1236_vm13, %v2311_v6, %v1220_v59  ;;  %v1377_v57 = vmul.f32 %v2388_v17, %v1265_v63 }
 0x22a   :  { %v1222_v54 = vpack.c.bf16 %v1532_v19, %v1532_v19  ;;  %v1391_v29 = vadd.f32 %v1376_v24, %v1375_v26  ;;  %v1378_v16 = vmul.f32 %v2392_v43, %v1266_v46  ;;  %v1268_v35 = vunpack.c.l.bf16 %v1252_v10  ;;  %v1338_v43 = vpop.permute.xlu1 %1337  ;;  %v1343_v19 = vpop.permute.xlu2 %1342 }
 0x22b   :  { %v1632_v44 = vpop.eup %1631  ;;  %v1153_v22 = vmul.f32 1.442695, %v1128_v55  ;;  %v1536_v2 = vadd.f32 -1.0, %v1194_v38  ;;  %v1379_v55 = vmul.f32 %v1318_v37, %v1267_v31  ;;  %vm2506_vm9 = vcmp.gt.f32.partialorder %v1068_v5, 0.0 }
 0x22c   :  { %v1634_v27 = vpop.eup %1633  ;;  %v1175_v56 = vpack.c.bf16 %v1632_v44, %v1632_v44  ;;  %v1254_v11 = vsel %vm1238_vm2, %v2338_v20, %v1222_v54  ;;  %v1392_v0 = vadd.f32 %v1391_v29, %v1377_v57  ;;  %v1269_v44 = vunpack.c.l.bf16 %v1253_v13  ;;  %vm1244_vm13 = vmpackc.low %vm2506_vm9, %vm2506_vm9 }
 0x22d   :  { %v1636_v30 = vpop.eup %1635  ;;  %1641 = vpow2.f32 %v1153_v22  ;;  %v1179_v33 = vpack.c.bf16 %v1634_v27, %v1634_v27  ;;  %v1380_v27 = vmul.f32 %v1323_v62, %v1268_v35  ;;  %v1270_v37 = vunpack.c.l.bf16 %v1254_v11 }
 0x22e   :  { %v1191_v48 = vunpack.c.l.bf16 %v1175_v56  ;;  %v1638_v9 = vpop.eup %1637  ;;  %v1180_v42 = vpack.c.bf16 %v1636_v30, %v1636_v30  ;;  %v1393_v20 = vadd.f32 %v1392_v0, %v1378_v16  ;;  %v1225_v56 = vpack.c.bf16 %v1535_v47, %v1535_v47 }
 0x22f   :  { %v1640_v17 = vpop.eup %1639  ;;  %v1195_v61 = vunpack.c.l.bf16 %v1179_v33  ;;  %v1181_v50 = vpack.c.bf16 %v1638_v9, %v1638_v9  ;;  %v1226_v40 = vpack.c.bf16 %v1536_v2, %v1536_v2  ;;  %v1381_v14 = vmul.f32 %v1328_v15, %v1269_v44 }
 0x230   :  { %v1533_v36 = vadd.f32 -1.0, %v1191_v48  ;;  %v1196_v63 = vunpack.c.l.bf16 %v1180_v42  ;;  %v1182_v39 = vpack.c.bf16 %v1640_v17, %v1640_v17  ;;  %v1394_v34 = vadd.f32 %v1393_v20, %v1379_v55 }
 0x231   :  { %v1537_v22 = vadd.f32 -1.0, %v1195_v61  ;;  %v1197_v30 = vunpack.c.l.bf16 %v1181_v50  ;;  %v1382_v33 = vmul.f32 %v1333_v45, %v1270_v37  ;;  %v1257_v10 = vsel %vm1241_vm6, %v2266_v23, %v1225_v56  ;;  %v1348_v23 = vpop.permute.xlu0 %1347 }
 0x232   :  { %v1223_v1 = vpack.c.bf16 %v1533_v36, %v1533_v36  ;;  %v1198_v46 = vunpack.c.l.bf16 %v1182_v39  ;;  %v1395_v15 = vadd.f32 %v1394_v34, %v1380_v27  ;;  %v1258_v57 = vsel %vm1242_vm8, %v2302_v58, %v1226_v40  ;;  %v1353_v18 = vpop.permute.xlu1 %1352  ;;  %v1358_v35 = vpop.permute.xlu2 %1357 }
 0x233   :  { %v1642_v7 = vpop.eup %1641  ;;  %v1227_v60 = vpack.c.bf16 %v1537_v22, %v1537_v22  ;;  %v1539_v21 = vadd.f32 -1.0, %v1197_v30  ;;  %v1273_v42 = vunpack.c.l.bf16 %v1257_v10  ;;  %v1274_v16 = vunpack.c.l.bf16 %v1258_v57 }
 0x234   :  { %v1255_v28 = vsel %vm1239_vm3, %v2359_v51, %v1223_v1  ;;  %v1176_v59 = vpack.c.bf16 %v1642_v7, %v1642_v7  ;;  %v1538_v51 = vadd.f32 -1.0, %v1196_v63  ;;  %v1396_v52 = vadd.f32 %v1395_v15, %v1381_v14 }
 0x235   :  { %v1271_v24 = vunpack.c.l.bf16 %v1255_v28  ;;  %v1540_v36 = vadd.f32 -1.0, %v1198_v46  ;;  %v1259_v17 = vsel %vm1243_vm11, %v2318_v49, %v1227_v60  ;;  %v1229_v29 = vpack.c.bf16 %v1539_v21, %v1539_v21 }
 0x236   :  { %v1192_v26 = vunpack.c.l.bf16 %v1176_v59  ;;  %v1228_v31 = vpack.c.bf16 %v1538_v51, %v1538_v51  ;;  %v1397_v5 = vadd.f32 %v1396_v52, %v1382_v33  ;;  %v1385_v47 = vmul.f32 %v1348_v23, %v1273_v42 }
 0x237   :  { %v1383_v38 = vmul.f32 %v1338_v43, %v1271_v24  ;;  %v1230_v45 = vpack.c.bf16 %v1540_v36, %v1540_v36  ;;  %v1275_v49 = vunpack.c.l.bf16 %v1259_v17  ;;  %v1261_v3 = vsel %vm1245_vm15, %v2326_v41, %v1229_v29 }
 0x238   :  { %v1534_v48 = vadd.f32 -1.0, %v1192_v26  ;;  %v1260_v1 = vsel %vm1244_vm13, %v2320_v25, %v1228_v31  ;;  %v1386_v50 = vmul.f32 %v1353_v18, %v1274_v16  ;;  %v1277_v55 = vunpack.c.l.bf16 %v1261_v3 }
 0x239   :  { %v1398_v58 = vadd.f32 %v1397_v5, %v1383_v38  ;;  %v1276_v11 = vunpack.c.l.bf16 %v1260_v1  ;;  %v1262_v2 = vsel %vm1246_vm0, %v2334_v12, %v1230_v45  ;;  %v1387_v0 = vmul.f32 %v1358_v35, %v1275_v49  ;;  %v1363_v25 = vpop.permute.xlu0 %1362 }
 0x23a   :  { %v1224_v54 = vpack.c.bf16 %v1534_v48, %v1534_v48  ;;  %v1278_v63 = vunpack.c.l.bf16 %v1262_v2  ;;  %v1368_v39 = vpop.permute.xlu1 %1367  ;;  %v1373_v8 = vpop.permute.xlu2 %1372  ;;  %v1413_v12 = vstv %s2541_s6 }
 0x23b   :  { %v1388_v43 = vmul.f32 %v1363_v25, %v1276_v11  ;;  %v1389_v28 = vmul.f32 %v1368_v39, %v1277_v55 }
 0x23c   :  { %v1256_v6 = vsel %vm1240_vm10, %v2390_v32, %v1224_v54  ;;  %v1390_v20 = vmul.f32 %v1373_v8, %v1278_v63 }
 0x23d   :  { %v1272_v13 = vunpack.c.l.bf16 %v1256_v6 }
 0x23f   :  { %v1384_v32 = vmul.f32 %v1343_v19, %v1272_v13 }
 0x241   :  { %v1399_v61 = vadd.f32 %v1398_v58, %v1384_v32 }
 0x243   :  { %v1400_v7 = vadd.f32 %v1399_v61, %v1385_v47 }
 0x245   :  { %v1401_v44 = vadd.f32 %v1400_v7, %v1386_v50 }
 0x247   :  { %v1402_v53 = vadd.f32 %v1401_v44, %v1387_v0 }
 0x249   :  { %v1403_v59 = vadd.f32 %v1402_v53, %v1388_v43 }
 0x24b   :  { %v1404_v27 = vadd.f32 %v1403_v59, %v1389_v28 }
 0x24d   :  { %v1405_v41 = vadd.f32 %v1404_v27, %v1390_v20 }
 0x24f   :  { %v1406_v37 = vrot.slane %v1405_v41, 4 }
 0x251   :  { %v1407_v19 = vadd.f32 %v1406_v37, %v1405_v41 }
 0x253   :  { %v1408_v56 = vrot.slane %v1407_v19, 2 }
 0x255   :  { %v1409_v22 = vadd.f32 %v1408_v56, %v1407_v19 }
 0x257   :  { %v1410_v30 = vrot.slane %v1409_v22, 1 }
 0x259   :  { %v1411_v26 = vadd.f32 %v1410_v30, %v1409_v22 }
 0x25b   :  { %v1414_v40 = vadd.f32 %v1413_v12, %v1411_v26 }
 0x25d   :  { %v1415_v34 = vsub.f32 0.0, %v1414_v40 }
 0x25f   :  { %v1416_v14 = vmul.f32 1.442695, %v1415_v34 }
 0x261   :  { %1643 = vpow2.f32 %v1416_v14 }
 0x267   :  { %v1644_v24 = vpop.eup %1643 }
 0x268   :  { %v1418_v51 = vadd.f32 1.0, %v1644_v24 }
 0x26a   :  { %1645 = vrcp.f32 %v1418_v51 }
 0x270   :  { %v1646_v46 = vpop.eup %1645 }
 0x271   :  { %1420 = vst [vmem:[#allocation3] sm:$0x1] %v1646_v46 }
 0x272   :  { %1431 = dma.vmem_to_hbm [thread:$0]  %s1427_s13, 16, %s1429_s16, [#allocation4]  }
 0x273   :  { %1671 = dma.done.wait [#allocation4], 16  }
 0x274   :  { %1672 = vsyncadd [#allocation4], 4294967280 }
 0x275   :  { %1436 = vsyncpa [#allocation4], 1 }

</bundles_post_ra>
